<compile_context>
chip_gen: v5e
topology: v5e:2x2
jax: 0.10.0
libtpu: 0.0.40
codegen_flags: <defaults>
</compile_context>

<pallas_src>
import functools

import jax
import jax.numpy as jnp
from jax.experimental import pallas as pl
from jax.experimental.pallas import tpu as pltpu


def _round_up(x, m):
    return ((x + m - 1) // m) * m


# ----------------------------------------------------------------------------
# Fused kernel: all GraphTripleConv layers + finalize, grid over layer index.
# ----------------------------------------------------------------------------
def _cgip_kernel(obj_in_ref, pred_in_ref, so_col_ref, s_row_ref, o_row_ref,
                 inv_deg_ref,
                 w1a_ref, b1a_ref, w1b_ref, b1b_ref,
                 w2a_ref, b2a_ref, w2b_ref, b2b_ref,
                 obj_img_ref, trip_img_ref, slot_ref,
                 inv_ocnt_ref, inv_tcnt_ref, wp_ref, bp_ref,
                 local_ref, global_ref,
                 obj_st, pred_st, gso_st, ssc_st, osc_st,
                 *, DP, HP, O, T):
    l = pl.program_id(0)
    nl = pl.num_programs(0)
    bf16 = jnp.bfloat16

    # ---- layer 0: load initial embeddings + build one-hot gather/scatter maps
    @pl.when(l == 0)
    def _init():
        obj_st[...] = obj_in_ref[...]
        pred_st[...] = pred_in_ref[...]
        # gather one-hot [s ; o]: (2T, O); entry (t, j) = 1 iff so_idx[t] == j
        col = jax.lax.broadcasted_iota(jnp.int32, (2 * T, O), 1)
        gso_st[...] = jnp.where(col == so_col_ref[...], 1.0, 0.0)
        # scatter one-hots: (O, T); entry (j, t) = 1 iff s[t] == j (resp. o[t] == j)
        row = jax.lax.broadcasted_iota(jnp.int32, (O, T), 0)
        ssc_st[...] = jnp.where(row == s_row_ref[...], 1.0, 0.0)
        osc_st[...] = jnp.where(row == o_row_ref[...], 1.0, 0.0)

    obj = obj_st[...]                                   # (O, DP) f32
    pred = pred_st[...]                                 # (T, DP) f32

    # ---- gather obj[s], obj[o]: exact f32 one-hot matmul, row-split (8-aligned)
    so_vecs = jnp.dot(gso_st[...], obj, preferred_element_type=jnp.float32)  # (2T, DP)
    s_vecs = so_vecs[:T]
    o_vecs = so_vecs[T:]

    # ---- net1 layer 1: split-dot accumulation (no lane-axis concat)
    h = (jnp.dot(s_vecs.astype(bf16), w1a_ref[0:DP, :],
                 preferred_element_type=jnp.float32)
         + jnp.dot(pred.astype(bf16), w1a_ref[DP:2 * DP, :],
                   preferred_element_type=jnp.float32)
         + jnp.dot(o_vecs.astype(bf16), w1a_ref[2 * DP:3 * DP, :],
                   preferred_element_type=jnp.float32)
         + b1a_ref[...])
    h = jnp.maximum(h, 0.0)                             # (T, HP)

    # ---- net1 layer 2: relu(h @ W1b + b1b); lane-aligned column splits
    t_new = jnp.dot(h.astype(bf16), w1b_ref[...],
                    preferred_element_type=jnp.float32) + b1b_ref[...]
    t_new = jnp.maximum(t_new, 0.0)                     # (T, 2HP + DP)
    new_s = t_new[:, 0:HP]
    new_p = t_new[:, HP:HP + DP]
    new_o = t_new[:, HP + DP:]

    # ---- scatter_add + avg pooling: two f32 one-hot dots, exact; 1/deg kept f32
    pooled = (jnp.dot(ssc_st[...], new_s, preferred_element_type=jnp.float32)
              + jnp.dot(osc_st[...], new_o, preferred_element_type=jnp.float32))
    pooled = pooled * inv_deg_ref[...]                  # (O, HP)

    # ---- net2: Linear+ReLU, Linear+ReLU
    h2 = jnp.maximum(
        jnp.dot(pooled.astype(bf16), w2a_ref[...],
                preferred_element_type=jnp.float32) + b2a_ref[...], 0.0)
    new_obj = jnp.maximum(
        jnp.dot(h2.astype(bf16), w2b_ref[...],
                preferred_element_type=jnp.float32) + b2b_ref[...], 0.0)

    obj_st[...] = new_obj
    pred_st[...] = new_p

    # ---- finalize on the last layer: per-image pooling + projection + locals
    @pl.when(l == nl - 1)
    def _finalize():
        BP = global_ref.shape[0]
        BM = local_ref.shape[0]

        # per-image avg pooling via in-kernel one-hots (BP, O) / (BP, T)
        obj_oh = jnp.where(
            jax.lax.broadcasted_iota(jnp.int32, (BP, O), 0) == obj_img_ref[...],
            1.0, 0.0)
        trip_oh = jnp.where(
            jax.lax.broadcasted_iota(jnp.int32, (BP, T), 0) == trip_img_ref[...],
            1.0, 0.0)
        obj_fea = jnp.dot(obj_oh, new_obj,
                          preferred_element_type=jnp.float32) * inv_ocnt_ref[...]
        pred_fea = jnp.dot(trip_oh, new_p,
                           preferred_element_type=jnp.float32) * inv_tcnt_ref[...]

        # graph_projection as two split dots (no lane concat)
        global_ref[...] = (
            jnp.dot(obj_fea.astype(bf16), wp_ref[0:DP, :],
                    preferred_element_type=jnp.float32)
            + jnp.dot(pred_fea.astype(bf16), wp_ref[DP:2 * DP, :],
                      preferred_element_type=jnp.float32)
            + bp_ref[...])

        # local triple features [obj[s] | pred | obj[o]] assigned to slots;
        # written as three 128-aligned lane-dense column blocks.
        so_f = jnp.dot(gso_st[...], new_obj, preferred_element_type=jnp.float32)
        slot_oh = jnp.where(
            jax.lax.broadcasted_iota(jnp.int32, (BM, T), 0) == slot_ref[...],
            1.0, 0.0)
        local_ref[:, 0:DP] = jnp.dot(slot_oh, so_f[:T],
                                     preferred_element_type=jnp.float32)
        local_ref[:, DP:2 * DP] = jnp.dot(slot_oh, new_p,
                                          preferred_element_type=jnp.float32)
        local_ref[:, 2 * DP:3 * DP] = jnp.dot(slot_oh, so_f[T:],
                                              preferred_element_type=jnp.float32)


# ----------------------------------------------------------------------------
# Deterministic synthetic parameters (shapes from CGIPModel.__init__),
# per-layer weights stacked along a leading layer axis (original shapes).
# ----------------------------------------------------------------------------
def _linear(key, fan_in, fan_out):
    wk, bk = jax.random.split(key)
    w = jax.random.normal(wk, (fan_in, fan_out), jnp.float32) * jnp.sqrt(2.0 / fan_in)
    b = jax.random.normal(bk, (1, fan_out), jnp.float32) * 0.01
    return w, b


def init_params(key, num_objs, num_preds, embed_dim, width, layers):
    D, H = embed_dim, width
    L = layers + 1                      # graph_conv + graph_net layers
    keys = iter(jax.random.split(key, 3 + 4 * L))
    params = {
        'obj_emb': jax.random.normal(next(keys), (num_objs + 1, D), jnp.float32) * 0.02,
        'pred_emb': jax.random.normal(next(keys), (num_preds, D), jnp.float32) * 0.02,
    }
    w1a, b1a, w1b, b1b, w2a, b2a, w2b, b2b = ([] for _ in range(8))
    for _ in range(L):
        w, b = _linear(next(keys), 3 * D, H); w1a.append(w); b1a.append(b)
        w, b = _linear(next(keys), H, 2 * H + D); w1b.append(w); b1b.append(b)
        w, b = _linear(next(keys), H, H); w2a.append(w); b2a.append(b)
        w, b = _linear(next(keys), H, D); w2b.append(w); b2b.append(b)
    params['w1a'] = jnp.stack(w1a); params['b1a'] = jnp.stack(b1a)
    params['w1b'] = jnp.stack(w1b); params['b1b'] = jnp.stack(b1b)
    params['w2a'] = jnp.stack(w2a); params['b2a'] = jnp.stack(b2a)
    params['w2b'] = jnp.stack(w2b); params['b2b'] = jnp.stack(b2b)
    wp, bp = _linear(next(keys), 2 * D, D)
    params['wp'] = wp
    params['bp'] = bp
    params['logit_scale'] = jnp.log(1.0 / 0.07)   # present in module, unused in forward
    return params


# ----------------------------------------------------------------------------
# Forward (CGIPModel.forward / encode_graph_local_global).
# ----------------------------------------------------------------------------
def cgip_forward(params, graph, max_sample_per_img):
    image, objs, boxes, triples, obj_to_img, triples_to_img = graph
    B = image.shape[0]
    s = triples[:, 0].astype(jnp.int32)
    p = triples[:, 1].astype(jnp.int32)
    o = triples[:, 2].astype(jnp.int32)

    f32, bf16 = jnp.float32, jnp.bfloat16

    # embedding lookups (glue)
    obj_vecs = jnp.take(params['obj_emb'], objs, axis=0)      # (O, D)
    pred_vecs = jnp.take(params['pred_emb'], p, axis=0)       # (T, D)
    O, D = obj_vecs.shape
    T = pred_vecs.shape[0]
    H = params['w1a'].shape[-1]
    L = params['w1a'].shape[0]

    # lane-aligned padded sizes
    DP = _round_up(D, 128)
    HP = _round_up(H, 128)
    BP = _round_up(B, 8)
    BM = B * max_sample_per_img
    BMP = _round_up(BM, 8)

    # zero-pad embeddings on the lane axis
    obj_in = jnp.zeros((O, DP), f32).at[:, :D].set(obj_vecs)
    pred_in = jnp.zeros((T, DP), f32).at[:, :D].set(pred_vecs)

    # small int32 index vectors -> one-hots are built in-kernel
    so_col = jnp.concatenate([s, o])[:, None]                  # (2T, 1)
    s_row = s[None, :]                                         # (1, T)
    o_row = o[None, :]                                         # (1, T)
    obj_img_row = obj_to_img.astype(jnp.int32)[None, :]        # (1, O)
    trip_img_row = triples_to_img.astype(jnp.int32)[None, :]   # (1, T)

    # graph-constant reciprocal counts (hoisted out of the per-layer kernel)
    deg = jnp.zeros((O,), f32).at[s].add(1.0).at[o].add(1.0)
    inv_deg = (1.0 / jnp.maximum(deg, 1.0))[:, None]                     # (O, 1)
    ocnt = jnp.zeros((B,), f32).at[obj_to_img].add(1.0)
    tcnt = jnp.zeros((B,), f32).at[triples_to_img].add(1.0)
    inv_ocnt = jnp.zeros((BP, 1), f32).at[:B, 0].set(1.0 / jnp.maximum(ocnt, 1.0))
    inv_tcnt = jnp.zeros((BP, 1), f32).at[:B, 0].set(1.0 / jnp.maximum(tcnt, 1.0))

    # slot index per triple (position within its image; overflow -> slot = -1).
    # TODO(synk): create_tensor_by_assign_samples_to_img is not defined in the
    # provided source; standard zero-pad / truncate-overflow semantics assumed.
    t2i = triples_to_img.astype(jnp.int32)
    t_oh = (t2i[:, None] == jnp.arange(B, dtype=jnp.int32)[None, :]).astype(jnp.int32)
    pos = jnp.take_along_axis(jnp.cumsum(t_oh, axis=0), t2i[:, None], axis=1)[:, 0] - 1
    slot = jnp.where(pos < max_sample_per_img, t2i * max_sample_per_img + pos, -1)
    slot_row = slot[None, :].astype(jnp.int32)                           # (1, T)

    # ---- pad stacked weights once to lane-aligned shapes (zeros preserve semantics)
    w1a = params['w1a'].reshape(L, 3, D, H)
    w1a_p = jnp.zeros((L, 3, DP, HP), f32).at[:, :, :D, :H].set(w1a).reshape(L, 3 * DP, HP)
    b1a_p = jnp.zeros((L, 1, HP), f32).at[:, :, :H].set(params['b1a'])

    w1b = params['w1b']
    w1b_p = jnp.zeros((L, HP, 2 * HP + DP), f32)
    w1b_p = w1b_p.at[:, :H, :H].set(w1b[:, :, :H])
    w1b_p = w1b_p.at[:, :H, HP:HP + D].set(w1b[:, :, H:H + D])
    w1b_p = w1b_p.at[:, :H, HP + DP:HP + DP + H].set(w1b[:, :, H + D:])
    b1b = params['b1b']
    b1b_p = jnp.zeros((L, 1, 2 * HP + DP), f32)
    b1b_p = b1b_p.at[:, :, :H].set(b1b[:, :, :H])
    b1b_p = b1b_p.at[:, :, HP:HP + D].set(b1b[:, :, H:H + D])
    b1b_p = b1b_p.at[:, :, HP + DP:HP + DP + H].set(b1b[:, :, H + D:])

    w2a_p = jnp.zeros((L, HP, HP), f32).at[:, :H, :H].set(params['w2a'])
    b2a_p = jnp.zeros((L, 1, HP), f32).at[:, :, :H].set(params['b2a'])
    w2b_p = jnp.zeros((L, HP, DP), f32).at[:, :H, :D].set(params['w2b'])
    b2b_p = jnp.zeros((L, 1, DP), f32).at[:, :, :D].set(params['b2b'])

    wp = params['wp']
    wp_p = (jnp.zeros((2 * DP, DP), f32)
            .at[:D, :D].set(wp[:D])
            .at[DP:DP + D, :D].set(wp[D:]))
    bp_p = jnp.zeros((1, DP), f32).at[:, :D].set(params['bp'])

    kernel = functools.partial(_cgip_kernel, DP=DP, HP=HP, O=O, T=T)

    grid_spec = pltpu.PrefetchScalarGridSpec(
        num_scalar_prefetch=0,
        grid=(L,),
        in_specs=[
            pl.BlockSpec((O, DP), lambda l: (0, 0)),                  # obj_vecs (init)
            pl.BlockSpec((T, DP), lambda l: (0, 0)),                  # pred_vecs (init)
            pl.BlockSpec((2 * T, 1), lambda l: (0, 0)),               # so_col
            pl.BlockSpec((1, T), lambda l: (0, 0)),                   # s_row
            pl.BlockSpec((1, T), lambda l: (0, 0)),                   # o_row
            pl.BlockSpec((O, 1), lambda l: (0, 0)),                   # inv_deg
            pl.BlockSpec((None, 3 * DP, HP), lambda l: (l, 0, 0)),    # W1a[l]
            pl.BlockSpec((None, 1, HP), lambda l: (l, 0, 0)),         # b1a[l]
            pl.BlockSpec((None, HP, 2 * HP + DP), lambda l: (l, 0, 0)),  # W1b[l]
            pl.BlockSpec((None, 1, 2 * HP + DP), lambda l: (l, 0, 0)),   # b1b[l]
            pl.BlockSpec((None, HP, HP), lambda l: (l, 0, 0)),        # W2a[l]
            pl.BlockSpec((None, 1, HP), lambda l: (l, 0, 0)),         # b2a[l]
            pl.BlockSpec((None, HP, DP), lambda l: (l, 0, 0)),        # W2b[l]
            pl.BlockSpec((None, 1, DP), lambda l: (l, 0, 0)),         # b2b[l]
            pl.BlockSpec((1, O), lambda l: (0, 0)),                   # obj_to_img
            pl.BlockSpec((1, T), lambda l: (0, 0)),                   # triples_to_img
            pl.BlockSpec((1, T), lambda l: (0, 0)),                   # slot per triple
            pl.BlockSpec((BP, 1), lambda l: (0, 0)),                  # inv_ocnt
            pl.BlockSpec((BP, 1), lambda l: (0, 0)),                  # inv_tcnt
            pl.BlockSpec((2 * DP, DP), lambda l: (0, 0)),             # Wp
            pl.BlockSpec((1, DP), lambda l: (0, 0)),                  # bp
        ],
        out_specs=(
            pl.BlockSpec((BMP, 3 * DP), lambda l: (0, 0)),            # local slab
            pl.BlockSpec((BP, DP), lambda l: (0, 0)),                 # global feature
        ),
        scratch_shapes=[
            pltpu.VMEM((O, DP), jnp.float32),       # obj state (carried)
            pltpu.VMEM((T, DP), jnp.float32),       # pred state (carried)
            pltpu.VMEM((2 * T, O), jnp.float32),    # gather one-hot [s; o]
            pltpu.VMEM((O, T), jnp.float32),        # scatter one-hot (s)
            pltpu.VMEM((O, T), jnp.float32),        # scatter one-hot (o)
        ],
    )

    local_pad, global_pad = pl.pallas_call(
        kernel,
        out_shape=(jax.ShapeDtypeStruct((BMP, 3 * DP), jnp.float32),
                   jax.ShapeDtypeStruct((BP, DP), jnp.float32)),
        grid_spec=grid_spec,
        compiler_params=pltpu.CompilerParams(
            dimension_semantics=("arbitrary",),       # layer axis carries state
            vmem_limit_bytes=32 * 1024 * 1024),
    )(obj_in, pred_in, so_col, s_row, o_row, inv_deg,
      w1a_p.astype(bf16), b1a_p, w1b_p.astype(bf16), b1b_p,
      w2a_p.astype(bf16), b2a_p, w2b_p.astype(bf16), b2b_p,
      obj_img_row, trip_img_row, slot_row, inv_ocnt, inv_tcnt,
      wp_p.astype(bf16), bp_p)

    # slice lane/sublane padding back off (cheap XLA glue)
    local = local_pad[:BM]
    graph_local_fea = jnp.concatenate(
        [local[:, :D], local[:, DP:DP + D], local[:, 2 * DP:2 * DP + D]],
        axis=1).reshape(B, max_sample_per_img, 3 * D)
    graph_global_fea = global_pad[:B, :D]
    return graph_local_fea, graph_global_fea


if __name__ == "__main__":
    num_objs, num_preds = 10, 6
    embed_dim, width, layers = 32, 64, 2
    max_sample_per_img = 5
    B, O, T = 2, 8, 8

    key = jax.random.PRNGKey(0)
    pkey, dkey = jax.random.split(key)
    params = init_params(pkey, num_objs, num_preds, embed_dim, width, layers)

    k1, k2, k3, k4, k5, k6 = jax.random.split(dkey, 6)
    image = jax.random.normal(k1, (B, 3, 16, 16), jnp.float32)   # NCHW; only batch dim used
    objs = jax.random.randint(k2, (O,), 0, num_objs + 1, jnp.int32)
    boxes = jax.random.uniform(k3, (O, 4), jnp.float32)          # unused by forward
    s_idx = jax.random.randint(k4, (T,), 0, O, jnp.int32)
    o_idx = jax.random.randint(k5, (T,), 0, O, jnp.int32)
    p_idx = jax.random.randint(k6, (T,), 0, num_preds, jnp.int32)
    triples = jnp.stack([s_idx, p_idx, o_idx], axis=1)
    obj_to_img = jnp.array([0, 0, 0, 0, 1, 1, 1, 1], jnp.int32)
    triples_to_img = jnp.array([0, 0, 0, 0, 1, 1, 1, 1], jnp.int32)

    graph = (image, objs, boxes, triples, obj_to_img, triples_to_img)
    graph_local_fea, graph_global_fea = cgip_forward(params, graph, max_sample_per_img)
    jax.block_until_ready((graph_local_fea, graph_global_fea))

    assert graph_local_fea.shape == (B, max_sample_per_img, 3 * embed_dim)
    assert graph_global_fea.shape == (B, embed_dim)
    print("KERNEL_OK")
</pallas_src>

<mosaic_0001>
module attributes {stable_mosaic.version = 11 : i64} {
  func.func @_cgip_kernel(%arg0: i32, %arg1: memref<8x128xf32, #tpu.memory_space<vmem>>, %arg2: memref<8x128xf32, #tpu.memory_space<vmem>>, %arg3: memref<16x1xi32, #tpu.memory_space<vmem>>, %arg4: memref<1x8xi32, #tpu.memory_space<vmem>>, %arg5: memref<1x8xi32, #tpu.memory_space<vmem>>, %arg6: memref<8x1xf32, #tpu.memory_space<vmem>>, %arg7: memref<1x384x128xbf16, #tpu.memory_space<vmem>>, %arg8: memref<1x1x128xf32, #tpu.memory_space<vmem>>, %arg9: memref<1x128x384xbf16, #tpu.memory_space<vmem>>, %arg10: memref<1x1x384xf32, #tpu.memory_space<vmem>>, %arg11: memref<1x128x128xbf16, #tpu.memory_space<vmem>>, %arg12: memref<1x1x128xf32, #tpu.memory_space<vmem>>, %arg13: memref<1x128x128xbf16, #tpu.memory_space<vmem>>, %arg14: memref<1x1x128xf32, #tpu.memory_space<vmem>>, %arg15: memref<1x8xi32, #tpu.memory_space<vmem>>, %arg16: memref<1x8xi32, #tpu.memory_space<vmem>>, %arg17: memref<1x8xi32, #tpu.memory_space<vmem>>, %arg18: memref<8x1xf32, #tpu.memory_space<vmem>>, %arg19: memref<8x1xf32, #tpu.memory_space<vmem>>, %arg20: memref<256x128xbf16, #tpu.memory_space<vmem>>, %arg21: memref<1x128xf32, #tpu.memory_space<vmem>>, %arg22: memref<16x384xf32, #tpu.memory_space<vmem>>, %arg23: memref<8x128xf32, #tpu.memory_space<vmem>>, %arg24: memref<8x128xf32, #tpu.memory_space<vmem>>, %arg25: memref<8x128xf32, #tpu.memory_space<vmem>>, %arg26: memref<16x8xf32, #tpu.memory_space<vmem>>, %arg27: memref<8x8xf32, #tpu.memory_space<vmem>>, %arg28: memref<8x8xf32, #tpu.memory_space<vmem>>) attributes {dimension_semantics = [#tpu.dimension_semantics<arbitrary>], iteration_bounds = array<i64: 3>, scalar_prefetch = 0 : i64, scratch_operands = 5 : i64, tpu.core_type = #tpu.core_type<tc>, window_params = [{pipeline_mode = #tpu.pipeline_mode<synchronous>, transform_indices = @transform_0, window_bounds = array<i64: 8, 128>}, {pipeline_mode = #tpu.pipeline_mode<synchronous>, transform_indices = @transform_1, window_bounds = array<i64: 8, 128>}, {pipeline_mode = #tpu.pipeline_mode<synchronous>, transform_indices = @transform_2, window_bounds = array<i64: 16, 1>}, {pipeline_mode = #tpu.pipeline_mode<synchronous>, transform_indices = @transform_3, window_bounds = array<i64: 1, 8>}, {pipeline_mode = #tpu.pipeline_mode<synchronous>, transform_indices = @transform_4, window_bounds = array<i64: 1, 8>}, {pipeline_mode = #tpu.pipeline_mode<synchronous>, transform_indices = @transform_5, window_bounds = array<i64: 8, 1>}, {transform_indices = @transform_6, window_bounds = array<i64: 1, 384, 128>}, {transform_indices = @transform_7, window_bounds = array<i64: 1, 1, 128>}, {transform_indices = @transform_8, window_bounds = array<i64: 1, 128, 384>}, {transform_indices = @transform_9, window_bounds = array<i64: 1, 1, 384>}, {transform_indices = @transform_10, window_bounds = array<i64: 1, 128, 128>}, {transform_indices = @transform_11, window_bounds = array<i64: 1, 1, 128>}, {transform_indices = @transform_12, window_bounds = array<i64: 1, 128, 128>}, {transform_indices = @transform_13, window_bounds = array<i64: 1, 1, 128>}, {pipeline_mode = #tpu.pipeline_mode<synchronous>, transform_indices = @transform_14, window_bounds = array<i64: 1, 8>}, {pipeline_mode = #tpu.pipeline_mode<synchronous>, transform_indices = @transform_15, window_bounds = array<i64: 1, 8>}, {pipeline_mode = #tpu.pipeline_mode<synchronous>, transform_indices = @transform_16, window_bounds = array<i64: 1, 8>}, {pipeline_mode = #tpu.pipeline_mode<synchronous>, transform_indices = @transform_17, window_bounds = array<i64: 8, 1>}, {pipeline_mode = #tpu.pipeline_mode<synchronous>, transform_indices = @transform_18, window_bounds = array<i64: 8, 1>}, {pipeline_mode = #tpu.pipeline_mode<synchronous>, transform_indices = @transform_19, window_bounds = array<i64: 256, 128>}, {pipeline_mode = #tpu.pipeline_mode<synchronous>, transform_indices = @transform_20, window_bounds = array<i64: 1, 128>}, {pipeline_mode = #tpu.pipeline_mode<synchronous>, transform_indices = @transform_21, window_bounds = array<i64: 16, 384>}, {pipeline_mode = #tpu.pipeline_mode<synchronous>, transform_indices = @transform_22, window_bounds = array<i64: 8, 128>}]} {
    %c0_i32 = arith.constant 0 : i32
    %0 = arith.cmpi eq, %arg0, %c0_i32 : i32
    %1 = arith.extui %0 : i1 to i32
    %c0_i32_0 = arith.constant 0 : i32
    %2 = arith.cmpi ne, %1, %c0_i32_0 : i32
    scf.if %2 {
      %c0_57 = arith.constant 0 : index
      %c0_58 = arith.constant 0 : index
      %75 = vector.load %arg1[%c0_57, %c0_58] : memref<8x128xf32, #tpu.memory_space<vmem>>, vector<8x128xf32>
      %c0_59 = arith.constant 0 : index
      %c0_60 = arith.constant 0 : index
      %76 = vector.load %arg24[%c0_59, %c0_60] : memref<8x128xf32, #tpu.memory_space<vmem>>, vector<8x128xf32>
      tpu.vector_store %arg24[%c0_59, %c0_60], %75 {strides = array<i32>} : memref<8x128xf32, #tpu.memory_space<vmem>>, vector<8x128xf32>,
      %c0_61 = arith.constant 0 : index
      %c0_62 = arith.constant 0 : index
      %77 = vector.load %arg2[%c0_61, %c0_62] : memref<8x128xf32, #tpu.memory_space<vmem>>, vector<8x128xf32>
      %c0_63 = arith.constant 0 : index
      %c0_64 = arith.constant 0 : index
      %78 = vector.load %arg25[%c0_63, %c0_64] : memref<8x128xf32, #tpu.memory_space<vmem>>, vector<8x128xf32>
      tpu.vector_store %arg25[%c0_63, %c0_64], %77 {strides = array<i32>} : memref<8x128xf32, #tpu.memory_space<vmem>>, vector<8x128xf32>,
      %79 = tpu.iota {dimensions = array<i32: 1>} : vector<16x8xi32>
      %c0_65 = arith.constant 0 : index
      %c0_66 = arith.constant 0 : index
      %80 = vector.load %arg3[%c0_65, %c0_66] : memref<16x1xi32, #tpu.memory_space<vmem>>, vector<16x1xi32>
      %81 = vector.broadcast %80 : vector<16x1xi32> to vector<16x8xi32>
      %82 = arith.cmpi eq, %79, %81 : vector<16x8xi32>
      %cst_67 = arith.constant 1.000000e+00 : f32
      %cst_68 = arith.constant 0.000000e+00 : f32
      %83 = vector.broadcast %cst_67 : f32 to vector<16x8xf32>
      %84 = vector.broadcast %cst_68 : f32 to vector<16x8xf32>
      %85 = arith.select %82, %83, %84 : vector<16x8xi1>, vector<16x8xf32>
      %c0_69 = arith.constant 0 : index
      %c0_70 = arith.constant 0 : index
      %86 = vector.load %arg26[%c0_69, %c0_70] : memref<16x8xf32, #tpu.memory_space<vmem>>, vector<16x8xf32>
      tpu.vector_store %arg26[%c0_69, %c0_70], %85 {strides = array<i32>} : memref<16x8xf32, #tpu.memory_space<vmem>>, vector<16x8xf32>,
      %87 = tpu.iota {dimensions = array<i32: 0>} : vector<8x8xi32>
      %c0_71 = arith.constant 0 : index
      %c0_72 = arith.constant 0 : index
      %88 = vector.load %arg4[%c0_71, %c0_72] : memref<1x8xi32, #tpu.memory_space<vmem>>, vector<1x8xi32>
      %89 = vector.broadcast %88 : vector<1x8xi32> to vector<8x8xi32>
      %90 = arith.cmpi eq, %87, %89 : vector<8x8xi32>
      %cst_73 = arith.constant 1.000000e+00 : f32
      %cst_74 = arith.constant 0.000000e+00 : f32
      %91 = vector.broadcast %cst_73 : f32 to vector<8x8xf32>
      %92 = vector.broadcast %cst_74 : f32 to vector<8x8xf32>
      %93 = arith.select %90, %91, %92 : vector<8x8xi1>, vector<8x8xf32>
      %c0_75 = arith.constant 0 : index
      %c0_76 = arith.constant 0 : index
      %94 = vector.load %arg27[%c0_75, %c0_76] : memref<8x8xf32, #tpu.memory_space<vmem>>, vector<8x8xf32>
      tpu.vector_store %arg27[%c0_75, %c0_76], %93 {strides = array<i32>} : memref<8x8xf32, #tpu.memory_space<vmem>>, vector<8x8xf32>,
      %c0_77 = arith.constant 0 : index
      %c0_78 = arith.constant 0 : index
      %95 = vector.load %arg5[%c0_77, %c0_78] : memref<1x8xi32, #tpu.memory_space<vmem>>, vector<1x8xi32>
      %96 = vector.broadcast %95 : vector<1x8xi32> to vector<8x8xi32>
      %97 = arith.cmpi eq, %87, %96 : vector<8x8xi32>
      %cst_79 = arith.constant 1.000000e+00 : f32
      %cst_80 = arith.constant 0.000000e+00 : f32
      %98 = vector.broadcast %cst_79 : f32 to vector<8x8xf32>
      %99 = vector.broadcast %cst_80 : f32 to vector<8x8xf32>
      %100 = arith.select %97, %98, %99 : vector<8x8xi1>, vector<8x8xf32>
      %c0_81 = arith.constant 0 : index
      %c0_82 = arith.constant 0 : index
      %101 = vector.load %arg28[%c0_81, %c0_82] : memref<8x8xf32, #tpu.memory_space<vmem>>, vector<8x8xf32>
      tpu.vector_store %arg28[%c0_81, %c0_82], %100 {strides = array<i32>} : memref<8x8xf32, #tpu.memory_space<vmem>>, vector<8x8xf32>,
    } else {
    }
    %c0 = arith.constant 0 : index
    %c0_1 = arith.constant 0 : index
    %3 = vector.load %arg24[%c0, %c0_1] : memref<8x128xf32, #tpu.memory_space<vmem>>, vector<8x128xf32>
    %c0_2 = arith.constant 0 : index
    %c0_3 = arith.constant 0 : index
    %4 = vector.load %arg25[%c0_2, %c0_3] : memref<8x128xf32, #tpu.memory_space<vmem>>, vector<8x128xf32>
    %c0_4 = arith.constant 0 : index
    %c0_5 = arith.constant 0 : index
    %5 = vector.load %arg26[%c0_4, %c0_5] : memref<16x8xf32, #tpu.memory_space<vmem>>, vector<16x8xf32>
    %cst = arith.constant dense<0.000000e+00> : vector<16x128xf32>
    %6 = tpu.matmul %5, %3, %cst {dimension_numbers = #tpu.dot_dimension_numbers<[1], [0], [0], [1], [0, 0, 1, 1], [], []>} : vector<16x8xf32>, vector<8x128xf32>, vector<16x128xf32> -> vector<16x128xf32>
    %7 = vector.extract_strided_slice %6 {offsets = [0, 0], sizes = [8, 128], strides = [1, 1]} : vector<16x128xf32> to vector<8x128xf32>
    %8 = vector.extract_strided_slice %6 {offsets = [8, 0], sizes = [8, 128], strides = [1, 1]} : vector<16x128xf32> to vector<8x128xf32>
    %9 = arith.truncf %7 : vector<8x128xf32> to vector<8x128xbf16>
    %c0_6 = arith.constant 0 : index
    %c0_7 = arith.constant 0 : index
    %c0_8 = arith.constant 0 : index
    %10 = vector.load %arg7[%c0_6, %c0_7, %c0_8] : memref<1x384x128xbf16, #tpu.memory_space<vmem>>, vector<1x128x128xbf16>
    %11 = vector.shape_cast %10 : vector<1x128x128xbf16> to vector<128x128xbf16>
    %cst_9 = arith.constant dense<0.000000e+00> : vector<8x128xf32>
    %12 = tpu.matmul %9, %11, %cst_9 {dimension_numbers = #tpu.dot_dimension_numbers<[1], [0], [0], [1], [0, 0, 1, 1], [], []>} : vector<8x128xbf16>, vector<128x128xbf16>, vector<8x128xf32> -> vector<8x128xf32>
    %13 = arith.truncf %4 : vector<8x128xf32> to vector<8x128xbf16>
    %c0_10 = arith.constant 0 : index
    %c128 = arith.constant 128 : index
    %c0_11 = arith.constant 0 : index
    %14 = vector.load %arg7[%c0_10, %c128, %c0_11] : memref<1x384x128xbf16, #tpu.memory_space<vmem>>, vector<1x128x128xbf16>
    %15 = vector.shape_cast %14 : vector<1x128x128xbf16> to vector<128x128xbf16>
    %cst_12 = arith.constant dense<0.000000e+00> : vector<8x128xf32>
    %16 = tpu.matmul %13, %15, %cst_12 {dimension_numbers = #tpu.dot_dimension_numbers<[1], [0], [0], [1], [0, 0, 1, 1], [], []>} : vector<8x128xbf16>, vector<128x128xbf16>, vector<8x128xf32> -> vector<8x128xf32>
    %17 = arith.addf %12, %16 : vector<8x128xf32>
    %18 = arith.truncf %8 : vector<8x128xf32> to vector<8x128xbf16>
    %c0_13 = arith.constant 0 : index
    %c256 = arith.constant 256 : index
    %c0_14 = arith.constant 0 : index
    %19 = vector.load %arg7[%c0_13, %c256, %c0_14] : memref<1x384x128xbf16, #tpu.memory_space<vmem>>, vector<1x128x128xbf16>
    %20 = vector.shape_cast %19 : vector<1x128x128xbf16> to vector<128x128xbf16>
    %cst_15 = arith.constant dense<0.000000e+00> : vector<8x128xf32>
    %21 = tpu.matmul %18, %20, %cst_15 {dimension_numbers = #tpu.dot_dimension_numbers<[1], [0], [0], [1], [0, 0, 1, 1], [], []>} : vector<8x128xbf16>, vector<128x128xbf16>, vector<8x128xf32> -> vector<8x128xf32>
    %22 = arith.addf %17, %21 : vector<8x128xf32>
    %c0_16 = arith.constant 0 : index
    %c0_17 = arith.constant 0 : index
    %c0_18 = arith.constant 0 : index
    %23 = vector.load %arg8[%c0_16, %c0_17, %c0_18] : memref<1x1x128xf32, #tpu.memory_space<vmem>>, vector<1x1x128xf32>
    %24 = vector.shape_cast %23 : vector<1x1x128xf32> to vector<1x128xf32>
    %25 = vector.broadcast %24 : vector<1x128xf32> to vector<8x128xf32>
    %26 = arith.addf %22, %25 : vector<8x128xf32>
    %cst_19 = arith.constant 0.000000e+00 : f32
    %27 = vector.broadcast %cst_19 : f32 to vector<8x128xf32>
    %28 = arith.maximumf %26, %27 : vector<8x128xf32>
    %29 = arith.truncf %28 : vector<8x128xf32> to vector<8x128xbf16>
    %c0_20 = arith.constant 0 : index
    %c0_21 = arith.constant 0 : index
    %c0_22 = arith.constant 0 : index
    %30 = vector.load %arg9[%c0_20, %c0_21, %c0_22] : memref<1x128x384xbf16, #tpu.memory_space<vmem>>, vector<1x128x384xbf16>
    %31 = vector.shape_cast %30 : vector<1x128x384xbf16> to vector<128x384xbf16>
    %cst_23 = arith.constant dense<0.000000e+00> : vector<8x384xf32>
    %32 = tpu.matmul %29, %31, %cst_23 {dimension_numbers = #tpu.dot_dimension_numbers<[1], [0], [0], [1], [0, 0, 1, 1], [], []>} : vector<8x128xbf16>, vector<128x384xbf16>, vector<8x384xf32> -> vector<8x384xf32>
    %c0_24 = arith.constant 0 : index
    %c0_25 = arith.constant 0 : index
    %c0_26 = arith.constant 0 : index
    %33 = vector.load %arg10[%c0_24, %c0_25, %c0_26] : memref<1x1x384xf32, #tpu.memory_space<vmem>>, vector<1x1x384xf32>
    %34 = vector.shape_cast %33 : vector<1x1x384xf32> to vector<1x384xf32>
    %35 = vector.broadcast %34 : vector<1x384xf32> to vector<8x384xf32>
    %36 = arith.addf %32, %35 : vector<8x384xf32>
    %cst_27 = arith.constant 0.000000e+00 : f32
    %37 = vector.broadcast %cst_27 : f32 to vector<8x384xf32>
    %38 = arith.maximumf %36, %37 : vector<8x384xf32>
    %39 = vector.extract_strided_slice %38 {offsets = [0, 0], sizes = [8, 128], strides = [1, 1]} : vector<8x384xf32> to vector<8x128xf32>
    %40 = vector.extract_strided_slice %38 {offsets = [0, 128], sizes = [8, 128], strides = [1, 1]} : vector<8x384xf32> to vector<8x128xf32>
    %41 = vector.extract_strided_slice %38 {offsets = [0, 256], sizes = [8, 128], strides = [1, 1]} : vector<8x384xf32> to vector<8x128xf32>
    %c0_28 = arith.constant 0 : index
    %c0_29 = arith.constant 0 : index
    %42 = vector.load %arg27[%c0_28, %c0_29] : memref<8x8xf32, #tpu.memory_space<vmem>>, vector<8x8xf32>
    %cst_30 = arith.constant dense<0.000000e+00> : vector<8x128xf32>
    %43 = tpu.matmul %42, %39, %cst_30 {dimension_numbers = #tpu.dot_dimension_numbers<[1], [0], [0], [1], [0, 0, 1, 1], [], []>} : vector<8x8xf32>, vector<8x128xf32>, vector<8x128xf32> -> vector<8x128xf32>
    %c0_31 = arith.constant 0 : index
    %c0_32 = arith.constant 0 : index
    %44 = vector.load %arg28[%c0_31, %c0_32] : memref<8x8xf32, #tpu.memory_space<vmem>>, vector<8x8xf32>
    %cst_33 = arith.constant dense<0.000000e+00> : vector<8x128xf32>
    %45 = tpu.matmul %44, %41, %cst_33 {dimension_numbers = #tpu.dot_dimension_numbers<[1], [0], [0], [1], [0, 0, 1, 1], [], []>} : vector<8x8xf32>, vector<8x128xf32>, vector<8x128xf32> -> vector<8x128xf32>
    %46 = arith.addf %43, %45 : vector<8x128xf32>
    %c0_34 = arith.constant 0 : index
    %c0_35 = arith.constant 0 : index
    %47 = vector.load %arg6[%c0_34, %c0_35] : memref<8x1xf32, #tpu.memory_space<vmem>>, vector<8x1xf32>
    %48 = vector.broadcast %47 : vector<8x1xf32> to vector<8x128xf32>
    %49 = arith.mulf %46, %48 : vector<8x128xf32>
    %50 = arith.truncf %49 : vector<8x128xf32> to vector<8x128xbf16>
    %c0_36 = arith.constant 0 : index
    %c0_37 = arith.constant 0 : index
    %c0_38 = arith.constant 0 : index
    %51 = vector.load %arg11[%c0_36, %c0_37, %c0_38] : memref<1x128x128xbf16, #tpu.memory_space<vmem>>, vector<1x128x128xbf16>
    %52 = vector.shape_cast %51 : vector<1x128x128xbf16> to vector<128x128xbf16>
    %cst_39 = arith.constant dense<0.000000e+00> : vector<8x128xf32>
    %53 = tpu.matmul %50, %52, %cst_39 {dimension_numbers = #tpu.dot_dimension_numbers<[1], [0], [0], [1], [0, 0, 1, 1], [], []>} : vector<8x128xbf16>, vector<128x128xbf16>, vector<8x128xf32> -> vector<8x128xf32>
    %c0_40 = arith.constant 0 : index
    %c0_41 = arith.constant 0 : index
    %c0_42 = arith.constant 0 : index
    %54 = vector.load %arg12[%c0_40, %c0_41, %c0_42] : memref<1x1x128xf32, #tpu.memory_space<vmem>>, vector<1x1x128xf32>
    %55 = vector.shape_cast %54 : vector<1x1x128xf32> to vector<1x128xf32>
    %56 = vector.broadcast %55 : vector<1x128xf32> to vector<8x128xf32>
    %57 = arith.addf %53, %56 : vector<8x128xf32>
    %cst_43 = arith.constant 0.000000e+00 : f32
    %58 = vector.broadcast %cst_43 : f32 to vector<8x128xf32>
    %59 = arith.maximumf %57, %58 : vector<8x128xf32>
    %60 = arith.truncf %59 : vector<8x128xf32> to vector<8x128xbf16>
    %c0_44 = arith.constant 0 : index
    %c0_45 = arith.constant 0 : index
    %c0_46 = arith.constant 0 : index
    %61 = vector.load %arg13[%c0_44, %c0_45, %c0_46] : memref<1x128x128xbf16, #tpu.memory_space<vmem>>, vector<1x128x128xbf16>
    %62 = vector.shape_cast %61 : vector<1x128x128xbf16> to vector<128x128xbf16>
    %cst_47 = arith.constant dense<0.000000e+00> : vector<8x128xf32>
    %63 = tpu.matmul %60, %62, %cst_47 {dimension_numbers = #tpu.dot_dimension_numbers<[1], [0], [0], [1], [0, 0, 1, 1], [], []>} : vector<8x128xbf16>, vector<128x128xbf16>, vector<8x128xf32> -> vector<8x128xf32>
    %c0_48 = arith.constant 0 : index
    %c0_49 = arith.constant 0 : index
    %c0_50 = arith.constant 0 : index
    %64 = vector.load %arg14[%c0_48, %c0_49, %c0_50] : memref<1x1x128xf32, #tpu.memory_space<vmem>>, vector<1x1x128xf32>
    %65 = vector.shape_cast %64 : vector<1x1x128xf32> to vector<1x128xf32>
    %66 = vector.broadcast %65 : vector<1x128xf32> to vector<8x128xf32>
    %67 = arith.addf %63, %66 : vector<8x128xf32>
    %cst_51 = arith.constant 0.000000e+00 : f32
    %68 = vector.broadcast %cst_51 : f32 to vector<8x128xf32>
    %69 = arith.maximumf %67, %68 : vector<8x128xf32>
    %c0_52 = arith.constant 0 : index
    %c0_53 = arith.constant 0 : index
    %70 = vector.load %arg24[%c0_52, %c0_53] : memref<8x128xf32, #tpu.memory_space<vmem>>, vector<8x128xf32>
    tpu.vector_store %arg24[%c0_52, %c0_53], %69 {strides = array<i32>} : memref<8x128xf32, #tpu.memory_space<vmem>>, vector<8x128xf32>,
    %c0_54 = arith.constant 0 : index
    %c0_55 = arith.constant 0 : index
    %71 = vector.load %arg25[%c0_54, %c0_55] : memref<8x128xf32, #tpu.memory_space<vmem>>, vector<8x128xf32>
    tpu.vector_store %arg25[%c0_54, %c0_55], %40 {strides = array<i32>} : memref<8x128xf32, #tpu.memory_space<vmem>>, vector<8x128xf32>,
    %c2_i32 = arith.constant 2 : i32
    %72 = arith.cmpi eq, %arg0, %c2_i32 : i32
    %73 = arith.extui %72 : i1 to i32
    %c0_i32_56 = arith.constant 0 : i32
    %74 = arith.cmpi ne, %73, %c0_i32_56 : i32
    scf.if %74 {
      %75 = tpu.iota {dimensions = array<i32: 0>} : vector<8x8xi32>
      %c0_57 = arith.constant 0 : index
      %c0_58 = arith.constant 0 : index
      %76 = vector.load %arg15[%c0_57, %c0_58] : memref<1x8xi32, #tpu.memory_space<vmem>>, vector<1x8xi32>
      %77 = vector.broadcast %76 : vector<1x8xi32> to vector<8x8xi32>
      %78 = arith.cmpi eq, %75, %77 : vector<8x8xi32>
      %cst_59 = arith.constant 1.000000e+00 : f32
      %cst_60 = arith.constant 0.000000e+00 : f32
      %79 = vector.broadcast %cst_59 : f32 to vector<8x8xf32>
      %80 = vector.broadcast %cst_60 : f32 to vector<8x8xf32>
      %81 = arith.select %78, %79, %80 : vector<8x8xi1>, vector<8x8xf32>
      %82 = tpu.iota {dimensions = array<i32: 0>} : vector<8x8xi32>
      %c0_61 = arith.constant 0 : index
      %c0_62 = arith.constant 0 : index
      %83 = vector.load %arg16[%c0_61, %c0_62] : memref<1x8xi32, #tpu.memory_space<vmem>>, vector<1x8xi32>
      %84 = vector.broadcast %83 : vector<1x8xi32> to vector<8x8xi32>
      %85 = arith.cmpi eq, %82, %84 : vector<8x8xi32>
      %cst_63 = arith.constant 1.000000e+00 : f32
      %cst_64 = arith.constant 0.000000e+00 : f32
      %86 = vector.broadcast %cst_63 : f32 to vector<8x8xf32>
      %87 = vector.broadcast %cst_64 : f32 to vector<8x8xf32>
      %88 = arith.select %85, %86, %87 : vector<8x8xi1>, vector<8x8xf32>
      %cst_65 = arith.constant dense<0.000000e+00> : vector<8x128xf32>
      %89 = tpu.matmul %81, %69, %cst_65 {dimension_numbers = #tpu.dot_dimension_numbers<[1], [0], [0], [1], [0, 0, 1, 1], [], []>} : vector<8x8xf32>, vector<8x128xf32>, vector<8x128xf32> -> vector<8x128xf32>
      %c0_66 = arith.constant 0 : index
      %c0_67 = arith.constant 0 : index
      %90 = vector.load %arg18[%c0_66, %c0_67] : memref<8x1xf32, #tpu.memory_space<vmem>>, vector<8x1xf32>
      %91 = vector.broadcast %90 : vector<8x1xf32> to vector<8x128xf32>
      %92 = arith.mulf %89, %91 : vector<8x128xf32>
      %cst_68 = arith.constant dense<0.000000e+00> : vector<8x128xf32>
      %93 = tpu.matmul %88, %40, %cst_68 {dimension_numbers = #tpu.dot_dimension_numbers<[1], [0], [0], [1], [0, 0, 1, 1], [], []>} : vector<8x8xf32>, vector<8x128xf32>, vector<8x128xf32> -> vector<8x128xf32>
      %c0_69 = arith.constant 0 : index
      %c0_70 = arith.constant 0 : index
      %94 = vector.load %arg19[%c0_69, %c0_70] : memref<8x1xf32, #tpu.memory_space<vmem>>, vector<8x1xf32>
      %95 = vector.broadcast %94 : vector<8x1xf32> to vector<8x128xf32>
      %96 = arith.mulf %93, %95 : vector<8x128xf32>
      %97 = arith.truncf %92 : vector<8x128xf32> to vector<8x128xbf16>
      %c0_71 = arith.constant 0 : index
      %c0_72 = arith.constant 0 : index
      %98 = vector.load %arg20[%c0_71, %c0_72] : memref<256x128xbf16, #tpu.memory_space<vmem>>, vector<128x128xbf16>
      %cst_73 = arith.constant dense<0.000000e+00> : vector<8x128xf32>
      %99 = tpu.matmul %97, %98, %cst_73 {dimension_numbers = #tpu.dot_dimension_numbers<[1], [0], [0], [1], [0, 0, 1, 1], [], []>} : vector<8x128xbf16>, vector<128x128xbf16>, vector<8x128xf32> -> vector<8x128xf32>
      %100 = arith.truncf %96 : vector<8x128xf32> to vector<8x128xbf16>
      %c128_74 = arith.constant 128 : index
      %c0_75 = arith.constant 0 : index
      %101 = vector.load %arg20[%c128_74, %c0_75] : memref<256x128xbf16, #tpu.memory_space<vmem>>, vector<128x128xbf16>
      %cst_76 = arith.constant dense<0.000000e+00> : vector<8x128xf32>
      %102 = tpu.matmul %100, %101, %cst_76 {dimension_numbers = #tpu.dot_dimension_numbers<[1], [0], [0], [1], [0, 0, 1, 1], [], []>} : vector<8x128xbf16>, vector<128x128xbf16>, vector<8x128xf32> -> vector<8x128xf32>
      %103 = arith.addf %99, %102 : vector<8x128xf32>
      %c0_77 = arith.constant 0 : index
      %c0_78 = arith.constant 0 : index
      %104 = vector.load %arg21[%c0_77, %c0_78] : memref<1x128xf32, #tpu.memory_space<vmem>>, vector<1x128xf32>
      %105 = vector.broadcast %104 : vector<1x128xf32> to vector<8x128xf32>
      %106 = arith.addf %103, %105 : vector<8x128xf32>
      %c0_79 = arith.constant 0 : index
      %c0_80 = arith.constant 0 : index
      %107 = vector.load %arg23[%c0_79, %c0_80] : memref<8x128xf32, #tpu.memory_space<vmem>>, vector<8x128xf32>
      tpu.vector_store %arg23[%c0_79, %c0_80], %106 {strides = array<i32>} : memref<8x128xf32, #tpu.memory_space<vmem>>, vector<8x128xf32>,
      %c0_81 = arith.constant 0 : index
      %c0_82 = arith.constant 0 : index
      %108 = vector.load %arg26[%c0_81, %c0_82] : memref<16x8xf32, #tpu.memory_space<vmem>>, vector<16x8xf32>
      %cst_83 = arith.constant dense<0.000000e+00> : vector<16x128xf32>
      %109 = tpu.matmul %108, %69, %cst_83 {dimension_numbers = #tpu.dot_dimension_numbers<[1], [0], [0], [1], [0, 0, 1, 1], [], []>} : vector<16x8xf32>, vector<8x128xf32>, vector<16x128xf32> -> vector<16x128xf32>
      %110 = tpu.iota {dimensions = array<i32: 0>} : vector<16x8xi32>
      %c0_84 = arith.constant 0 : index
      %c0_85 = arith.constant 0 : index
      %111 = vector.load %arg17[%c0_84, %c0_85] : memref<1x8xi32, #tpu.memory_space<vmem>>, vector<1x8xi32>
      %112 = vector.broadcast %111 : vector<1x8xi32> to vector<16x8xi32>
      %113 = arith.cmpi eq, %110, %112 : vector<16x8xi32>
      %cst_86 = arith.constant 1.000000e+00 : f32
      %cst_87 = arith.constant 0.000000e+00 : f32
      %114 = vector.broadcast %cst_86 : f32 to vector<16x8xf32>
      %115 = vector.broadcast %cst_87 : f32 to vector<16x8xf32>
      %116 = arith.select %113, %114, %115 : vector<16x8xi1>, vector<16x8xf32>
      %117 = vector.extract_strided_slice %109 {offsets = [0, 0], sizes = [8, 128], strides = [1, 1]} : vector<16x128xf32> to vector<8x128xf32>
      %cst_88 = arith.constant dense<0.000000e+00> : vector<16x128xf32>
      %118 = tpu.matmul %116, %117, %cst_88 {dimension_numbers = #tpu.dot_dimension_numbers<[1], [0], [0], [1], [0, 0, 1, 1], [], []>} : vector<16x8xf32>, vector<8x128xf32>, vector<16x128xf32> -> vector<16x128xf32>
      %c0_89 = arith.constant 0 : index
      %c0_90 = arith.constant 0 : index
      %119 = vector.load %arg22[%c0_89, %c0_90] : memref<16x384xf32, #tpu.memory_space<vmem>>, vector<16x128xf32>
      tpu.vector_store %arg22[%c0_89, %c0_90], %118 {strides = array<i32>} : memref<16x384xf32, #tpu.memory_space<vmem>>, vector<16x128xf32>,
      %cst_91 = arith.constant dense<0.000000e+00> : vector<16x128xf32>
      %120 = tpu.matmul %116, %40, %cst_91 {dimension_numbers = #tpu.dot_dimension_numbers<[1], [0], [0], [1], [0, 0, 1, 1], [], []>} : vector<16x8xf32>, vector<8x128xf32>, vector<16x128xf32> -> vector<16x128xf32>
      %c0_92 = arith.constant 0 : index
      %c128_93 = arith.constant 128 : index
      %121 = vector.load %arg22[%c0_92, %c128_93] : memref<16x384xf32, #tpu.memory_space<vmem>>, vector<16x128xf32>
      tpu.vector_store %arg22[%c0_92, %c128_93], %120 {strides = array<i32>} : memref<16x384xf32, #tpu.memory_space<vmem>>, vector<16x128xf32>,
      %122 = vector.extract_strided_slice %109 {offsets = [8, 0], sizes = [8, 128], strides = [1, 1]} : vector<16x128xf32> to vector<8x128xf32>
      %cst_94 = arith.constant dense<0.000000e+00> : vector<16x128xf32>
      %123 = tpu.matmul %116, %122, %cst_94 {dimension_numbers = #tpu.dot_dimension_numbers<[1], [0], [0], [1], [0, 0, 1, 1], [], []>} : vector<16x8xf32>, vector<8x128xf32>, vector<16x128xf32> -> vector<16x128xf32>
      %c0_95 = arith.constant 0 : index
      %c256_96 = arith.constant 256 : index
      %124 = vector.load %arg22[%c0_95, %c256_96] : memref<16x384xf32, #tpu.memory_space<vmem>>, vector<16x128xf32>
      tpu.vector_store %arg22[%c0_95, %c256_96], %123 {strides = array<i32>} : memref<16x384xf32, #tpu.memory_space<vmem>>, vector<16x128xf32>,
    } else {
    }
    return
  }
  func.func @transform_0(%arg0: i32) -> (i32, i32) {
    %c0_i32 = arith.constant 0 : i32
    %c0_i32_0 = arith.constant 0 : i32
    %c0_i32_1 = arith.constant 0 : i32
    return %c0_i32, %c0_i32_0 : i32, i32
  }
  func.func @transform_1(%arg0: i32) -> (i32, i32) {
    %c0_i32 = arith.constant 0 : i32
    %c0_i32_0 = arith.constant 0 : i32
    %c0_i32_1 = arith.constant 0 : i32
    return %c0_i32, %c0_i32_0 : i32, i32
  }
  func.func @transform_2(%arg0: i32) -> (i32, i32) {
    %c0_i32 = arith.constant 0 : i32
    %c0_i32_0 = arith.constant 0 : i32
    %c0_i32_1 = arith.constant 0 : i32
    return %c0_i32, %c0_i32_0 : i32, i32
  }
  func.func @transform_3(%arg0: i32) -> (i32, i32) {
    %c0_i32 = arith.constant 0 : i32
    %c0_i32_0 = arith.constant 0 : i32
    %c0_i32_1 = arith.constant 0 : i32
    return %c0_i32, %c0_i32_0 : i32, i32
  }
  func.func @transform_4(%arg0: i32) -> (i32, i32) {
    %c0_i32 = arith.constant 0 : i32
    %c0_i32_0 = arith.constant 0 : i32
    %c0_i32_1 = arith.constant 0 : i32
    return %c0_i32, %c0_i32_0 : i32, i32
  }
  func.func @transform_5(%arg0: i32) -> (i32, i32) {
    %c0_i32 = arith.constant 0 : i32
    %c0_i32_0 = arith.constant 0 : i32
    %c0_i32_1 = arith.constant 0 : i32
    return %c0_i32, %c0_i32_0 : i32, i32
  }
  func.func @transform_6(%arg0: i32) -> (i32, i32, i32) {
    %c0_i32 = arith.constant 0 : i32
    %c0_i32_0 = arith.constant 0 : i32
    %c0_i32_1 = arith.constant 0 : i32
    return %arg0, %c0_i32, %c0_i32_0 : i32, i32, i32
  }
  func.func @transform_7(%arg0: i32) -> (i32, i32, i32) {
    %c0_i32 = arith.constant 0 : i32
    %c0_i32_0 = arith.constant 0 : i32
    %c0_i32_1 = arith.constant 0 : i32
    return %arg0, %c0_i32, %c0_i32_0 : i32, i32, i32
  }
  func.func @transform_8(%arg0: i32) -> (i32, i32, i32) {
    %c0_i32 = arith.constant 0 : i32
    %c0_i32_0 = arith.constant 0 : i32
    %c0_i32_1 = arith.constant 0 : i32
    return %arg0, %c0_i32, %c0_i32_0 : i32, i32, i32
  }
  func.func @transform_9(%arg0: i32) -> (i32, i32, i32) {
    %c0_i32 = arith.constant 0 : i32
    %c0_i32_0 = arith.constant 0 : i32
    %c0_i32_1 = arith.constant 0 : i32
    return %arg0, %c0_i32, %c0_i32_0 : i32, i32, i32
  }
  func.func @transform_10(%arg0: i32) -> (i32, i32, i32) {
    %c0_i32 = arith.constant 0 : i32
    %c0_i32_0 = arith.constant 0 : i32
    %c0_i32_1 = arith.constant 0 : i32
    return %arg0, %c0_i32, %c0_i32_0 : i32, i32, i32
  }
  func.func @transform_11(%arg0: i32) -> (i32, i32, i32) {
    %c0_i32 = arith.constant 0 : i32
    %c0_i32_0 = arith.constant 0 : i32
    %c0_i32_1 = arith.constant 0 : i32
    return %arg0, %c0_i32, %c0_i32_0 : i32, i32, i32
  }
  func.func @transform_12(%arg0: i32) -> (i32, i32, i32) {
    %c0_i32 = arith.constant 0 : i32
    %c0_i32_0 = arith.constant 0 : i32
    %c0_i32_1 = arith.constant 0 : i32
    return %arg0, %c0_i32, %c0_i32_0 : i32, i32, i32
  }
  func.func @transform_13(%arg0: i32) -> (i32, i32, i32) {
    %c0_i32 = arith.constant 0 : i32
    %c0_i32_0 = arith.constant 0 : i32
    %c0_i32_1 = arith.constant 0 : i32
    return %arg0, %c0_i32, %c0_i32_0 : i32, i32, i32
  }
  func.func @transform_14(%arg0: i32) -> (i32, i32) {
    %c0_i32 = arith.constant 0 : i32
    %c0_i32_0 = arith.constant 0 : i32
    %c0_i32_1 = arith.constant 0 : i32
    return %c0_i32, %c0_i32_0 : i32, i32
  }
  func.func @transform_15(%arg0: i32) -> (i32, i32) {
    %c0_i32 = arith.constant 0 : i32
    %c0_i32_0 = arith.constant 0 : i32
    %c0_i32_1 = arith.constant 0 : i32
    return %c0_i32, %c0_i32_0 : i32, i32
  }
  func.func @transform_16(%arg0: i32) -> (i32, i32) {
    %c0_i32 = arith.constant 0 : i32
    %c0_i32_0 = arith.constant 0 : i32
    %c0_i32_1 = arith.constant 0 : i32
    return %c0_i32, %c0_i32_0 : i32, i32
  }
  func.func @transform_17(%arg0: i32) -> (i32, i32) {
    %c0_i32 = arith.constant 0 : i32
    %c0_i32_0 = arith.constant 0 : i32
    %c0_i32_1 = arith.constant 0 : i32
    return %c0_i32, %c0_i32_0 : i32, i32
  }
  func.func @transform_18(%arg0: i32) -> (i32, i32) {
    %c0_i32 = arith.constant 0 : i32
    %c0_i32_0 = arith.constant 0 : i32
    %c0_i32_1 = arith.constant 0 : i32
    return %c0_i32, %c0_i32_0 : i32, i32
  }
  func.func @transform_19(%arg0: i32) -> (i32, i32) {
    %c0_i32 = arith.constant 0 : i32
    %c0_i32_0 = arith.constant 0 : i32
    %c0_i32_1 = arith.constant 0 : i32
    return %c0_i32, %c0_i32_0 : i32, i32
  }
  func.func @transform_20(%arg0: i32) -> (i32, i32) {
    %c0_i32 = arith.constant 0 : i32
    %c0_i32_0 = arith.constant 0 : i32
    %c0_i32_1 = arith.constant 0 : i32
    return %c0_i32, %c0_i32_0 : i32, i32
  }
  func.func @transform_21(%arg0: i32) -> (i32, i32) {
    %c0_i32 = arith.constant 0 : i32
    %c0_i32_0 = arith.constant 0 : i32
    %c0_i32_1 = arith.constant 0 : i32
    return %c0_i32, %c0_i32_0 : i32, i32
  }
  func.func @transform_22(%arg0: i32) -> (i32, i32) {
    %c0_i32 = arith.constant 0 : i32
    %c0_i32_0 = arith.constant 0 : i32
    %c0_i32_1 = arith.constant 0 : i32
    return %c0_i32, %c0_i32_0 : i32, i32
  }
}

</mosaic_0001>

<bundles_post_ra>
// kernel: tpu_custom_call.1
= control target key start
LH: loop header
LB: loop body
LE: loop exit
PB: predicated region body
PF: predicated region fallthrough
CT: control target
= control target key end

     0   :  { %s3534_s0 = inlined_call_operand.vmem [shape: f32[8,128], index: 0, kind: input, shape index: {}]   ;;  %s3535_s1 = inlined_call_operand.vmem [shape: f32[8,128], index: 1, kind: input, shape index: {}]   ;;  %s3536_s2 = inlined_call_operand.vmem [shape: s32[16,1], index: 2, kind: input, shape index: {}]   ;;  %s3537_s3 = inlined_call_operand.vmem [shape: s32[1,8], index: 3, kind: input, shape index: {}]   ;;  %s3538_s4 = inlined_call_operand.vmem [shape: s32[1,8], index: 4, kind: input, shape index: {}]   ;;  %s3539_s5 = inlined_call_operand.vmem [shape: f32[8,1], index: 5, kind: input, shape index: {}]   ;;  %s3540_s6 = inlined_call_operand.hbm [shape: bf16[3,384,128], index: 6, kind: input, shape index: {}]   ;;  %s3541_s7 = inlined_call_operand.vmem [shape: f32[3,1,128], index: 7, kind: input, shape index: {}]   ;;  %s3542_s8 = inlined_call_operand.hbm [shape: bf16[3,128,384], index: 8, kind: input, shape index: {}]   ;;  %s3543_s9 = inlined_call_operand.vmem [shape: f32[3,1,384], index: 9, kind: input, shape index: {}]   ;;  %s3544_s10 = inlined_call_operand.hbm [shape: bf16[3,128,128], index: 10, kind: input, shape index: {}]   ;;  %s3545_s11 = inlined_call_operand.vmem [shape: f32[3,1,128], index: 11, kind: input, shape index: {}]   ;;  %s3546_s12 = inlined_call_operand.hbm [shape: bf16[3,128,128], index: 12, kind: input, shape index: {}]   ;;  %s3547_s13 = inlined_call_operand.vmem [shape: f32[3,1,128], index: 13, kind: input, shape index: {}]   ;;  %s3548_s14 = inlined_call_operand.vmem [shape: s32[1,8], index: 14, kind: input, shape index: {}]   ;;  %s3549_s15 = inlined_call_operand.vmem [shape: s32[1,8], index: 15, kind: input, shape index: {}]   ;;  %s3550_s16 = inlined_call_operand.vmem [shape: s32[1,8], index: 16, kind: input, shape index: {}]   ;;  %s3551_s17 = inlined_call_operand.vmem [shape: f32[8,1], index: 17, kind: input, shape index: {}]   ;;  %s3552_s18 = inlined_call_operand.vmem [shape: f32[8,1], index: 18, kind: input, shape index: {}]   ;;  %s3553_s19 = inlined_call_operand.hbm [shape: bf16[256,128], index: 19, kind: input, shape index: {}]   ;;  %s3554_s20 = inlined_call_operand.vmem [shape: f32[1,128], index: 20, kind: input, shape index: {}]   ;;  %s3555_s21 = inlined_call_operand.hbm [shape: f32[16,384], index: 21, kind: output, shape index: {0}]   ;;  %s3556_s22 = inlined_call_operand.hbm [shape: f32[8,128], index: 22, kind: output, shape index: {1}]  }
   0x1   :  { %3569 = sst [smem:[#allocation28_spill]] %s3534_s0 }
   0x2   :  { %3570 = sst [smem:[#allocation29_spill]] %s3535_s1 }
   0x3   :  { %3571 = sst [smem:[#allocation30_spill]] %s3536_s2 }
   0x4   :  { %3572 = sst [smem:[#allocation31_spill]] %s3537_s3 }
   0x5   :  { %3573 = sst [smem:[#allocation32_spill]] %s3538_s4 }
   0x6   :  { %3574 = sst [smem:[#allocation33_spill]] %s3539_s5 }
   0x7   :  { %3575 = sst [smem:[#allocation34_spill]] %s3540_s6 }
   0x8   :  { %3576 = sst [smem:[#allocation35_spill]] %s3542_s8 }
   0x9   :  { %3577 = sst [smem:[#allocation36_spill]] %s3549_s15 }
   0xa   :  { %3578 = sst [smem:[#allocation37_spill]] %s3550_s16 }
   0xb   :  { %3579 = sst [smem:[#allocation38_spill]] %s3551_s17 }
   0xc   :  { %3580 = sst [smem:[#allocation39_spill]] %s3552_s18 }
   0xd   :  { %3581 = sst [smem:[#allocation40_spill]] %s3553_s19 }
   0xe   :  { %3582 = sst [smem:[#allocation41_spill]] %s3554_s20 }
   0xf   :  { %3583 = sst [smem:[#allocation42_spill]] %s3555_s21 }
  0x10   :  { %3584 = sst [smem:[#allocation43_spill]] %s3556_s22 }
  0x11   :  { %28 = vsyncpa [#allocation8], 0 }
  0x12   :  { %30 = vsyncpa [#allocation8 + $0x1], 0 }
  0x13   :  { %31 = vsyncpa [#allocation11], 0 }
  0x14   :  { %33 = vsyncpa [#allocation11 + $0x1], 0 }
  0x15   :  { %34 = vsyncpa [#allocation14], 0 }
  0x16   :  { %36 = vsyncpa [#allocation14 + $0x1], 0 }
  0x17   :  { %37 = vsyncpa [#allocation9], 0 }
  0x18   :  { %38 = vsyncpa [#allocation18], 0  ;;  %s3128_s3 = smov 0   ;;  %s3130_s28 = smov 0  }
  0x19   :  { %s3132_s29 = smov 0   ;;  %s3134_s30 = smov 0  }
  0x1a LB: > { %3585 = sst [smem:[#allocation25_spill]] %s2993_s29  ;;  %s3147_s4 = sadd.s32 4294967295, %s2997_s30   ;;  %s2997_s30 = sphi %s3134_s30, %s3612_s30   ;;  %s2993_s29 = sphi %s3132_s29, %s3614_s29   ;;  %s2989_s28 = sphi %s3130_s28, %s3616_s28   ;;  %s2985_s3 = sphi %s3128_s3, %s3615_s3  }
  0x1b   : > { %p190_p0 = scmp.ne.s32.totalorder %s2989_s28, %s2985_s3  ;;  %p191_p1 = scmp.eq.s32.totalorder %s3147_s4, 0 }
  0x1c   : > { %p2190_p2 = scmp.ge.s32.totalorder %s2997_s30, 1  ;;  %p572_p3 = scmp.lt.s32.totalorder %s2997_s30, 4 }
  0x1d   : > { %p2191_p4 = scmp.ne.s32.totalorder %s3147_s4, 0  ;;  %p3156_p5 = por %p191_p1, %p190_p0 }
  0x1e   : > { %s3587_s19 = sld [smem:[#allocation40_spill]]  ;;  %p3163_p6 = pnand %p2190_p2, %p572_p3 }
  0x1f   : > { %s2999_s6 = smov [#allocation15]   ;;  %s3172_s26 = sadd.s32 1, %s2997_s30  }
  0x20   : > { %p2655_p7 = pneg %p3163_p6  ;;  %s618_s25 = sshll.u32 %s2999_s6, 4  ;;  %s619_s25 = int_to_ptr.vmem [resolvable:$true] %s618_s25 }
  0x21   : > { %3589 = sst [smem:[#allocation26_spill]] %s3172_s26  ;;  %s3559_s2 = smov 64  }
  0x22   : > { %p2656_p8 = pnand %p2655_p7, %p191_p1  ;;  %s3561_s27 = smov 4  }
  0x23   : > { %s174_s3 = ssub.s32 %s2997_s30, %s3172_s26  ;;  %s177_s23 = sadd.s32 1, %s2993_s29 }
  0x24   : > { %s616_s5 = sshll.u32 %s3587_s19, 4  ;;  %p175_p9 = scmp.eq.s32.totalorder %s174_s3, 0  ;;  %s617_s5 = int_to_ptr.hbm [resolvable:$true] %s616_s5 }
  0x25   : > { %2658 = dma.hbm_to_vmem [thread:$0]  (!%p2656_p8), %s617_s5, 2048, %s619_s25, [#allocation14], %s3559_s2, %s3559_s2, %s3561_s27  }
  0x26   : > { %p184_p10 = scmp.ne.s32.totalorder %s2993_s29, %s2989_s28  ;;  %p185_p11 = scmp.eq.s32.totalorder %s2997_s30, 0 }
  0x27   : > { %p2673_p12 = scmp.lt.s32.totalorder %s2997_s30, 3  ;;  %s3188_s6 = sand.u32 1, %s2993_s29  }
  0x28   : > { %s3185_s1 = scalar_select %p175_p9, %s2993_s29, %s177_s23  }
  0x29   : > { %p186_p13 = por %p185_p11, %p184_p10  ;;  %s3566_s19 = smul.u32 192, %s3188_s6 }
  0x2a   : > { %3590 = sst [smem:[#allocation27_spill]] %s3185_s1  ;;  %s3567_s22 = sand.u32 1, %s2997_s30  }
  0x2b   : > { %s3568_s21 = smul.u32 192, %s2997_s30  ;;  %p3193_p0 = pnand %p2673_p12, %p186_p13 }
  0x2c   : > { %s3592_s8 = sld [smem:[#allocation35_spill]]  ;;  %s667_s2 = scalar_lea.vmem [#allocation10], %s3566_s19 }
  0x2d   : > { %s675_s27 = sshll.u32 %s667_s2, 4  ;;  %s3206_s1 = scalar_lea.sflag [#allocation11], %s3567_s22  ;;  %s676_s27 = int_to_ptr.vmem [resolvable:$true] %s675_s27 }
  0x2e   : > { %p2771_p3 = pneg %p3193_p0 }
  0x32   : > { %s672_s3 = scalar_lea.hbm %s3592_s8, %s3568_s21 }
  0x33   : > { %s673_s23 = sshll.u32 %s672_s3, 4  ;;  %s2774_s3 = scalar_lea.hbm %s3592_s8, 576  ;;  %s674_s23 = int_to_ptr.hbm [resolvable:$true] %s673_s23 }
  0x34   : > { %s2767_s29 = sshra.s32 %s674_s23, 4  ;;  %s2768_s29 = int_to_ptr.hbm [resolvable:$true] %s2767_s29 }
  0x35   : > { %s2769_s26 = scalar_lea.hbm %s2768_s29, 192  ;;  %p2775_p9 = scmp.lt.s32.totalorder %s2768_s29, %s3592_s8 }
  0x36   : > { %p2770_p2 = scmp.ne.s32.totalorder %s2768_s29, %s2769_s26  ;;  %p2776_p10 = scmp.lt.s32.totalorder %s2774_s3, %s2769_s26 }
  0x38   : > { %p2772_p7 = pnand %p2771_p3, %p2770_p2  ;;  %p2777_p11 = por %p2776_p10, %p2775_p9 }
  0x3a   : > { %p2773_p8 = pneg %p2772_p7 }
  0x3c   : > { %p2778_p12 = pnand %p2777_p11, %p2773_p8 }
  0x3e   : > { %2781 = shalt.err (!%p2778_p12)
}
  0x3f   : > { %s3002_s22 = smov 192   ;;  %s3003_s21 = smov 12  }
  0x40   : > { %2665 = dma.hbm_to_vmem [thread:$0]  (!%p3193_p0), %s674_s23, 3072, %s676_s27, %s3206_s1, %s3002_s22, %s3002_s22, %s3003_s21  }
  0x41   : > { %s3593_s5 = smul.u32 192, %s2997_s30  ;;  %s3594_s18 = sld [smem:[#allocation34_spill]] }
  0x42   : > { %s3595_s26 = smul.u32 192, %s3188_s6  ;;  %s636_s8 = scalar_lea.sflag [#allocation8], %s3188_s6 }
  0x44   : > { %s639_s3 = scalar_lea.vmem [#allocation7], %s3595_s26 }
  0x45   : > { %s647_s2 = sshll.u32 %s639_s3, 4  ;;  %s648_s2 = int_to_ptr.vmem [resolvable:$true] %s647_s2 }
  0x47   : > { %s644_s19 = scalar_lea.hbm %s3594_s18, %s3593_s5  ;;  %s2804_s16 = scalar_lea.hbm %s3594_s18, 576 }
  0x48   : > { %s645_s29 = sshll.u32 %s644_s19, 4  ;;  %s646_s29 = int_to_ptr.hbm [resolvable:$true] %s645_s29 }
  0x49   : > { %s2797_s17 = sshra.s32 %s646_s29, 4  ;;  %s2798_s17 = int_to_ptr.hbm [resolvable:$true] %s2797_s17 }
  0x4a   : > { %s2799_s15 = scalar_lea.hbm %s2798_s17, 192  ;;  %p2805_p8 = scmp.lt.s32.totalorder %s2798_s17, %s3594_s18 }
  0x4b   : > { %p2800_p13 = scmp.ne.s32.totalorder %s2798_s17, %s2799_s15  ;;  %p2806_p9 = scmp.lt.s32.totalorder %s2804_s16, %s2799_s15 }
  0x4d   : > { %p2802_p2 = pnand %p2800_p13, %p2771_p3  ;;  %p2807_p10 = por %p2806_p9, %p2805_p8 }
  0x4f   : > { %p2803_p7 = pneg %p2802_p2 }
  0x51   : > { %p2808_p11 = pnand %p2807_p10, %p2803_p7 }
  0x53   : > { %2811 = shalt.err (!%p2808_p11)
}
  0x54   : > { %s3596_s5 = smov 4   ;;  %s3597_s25 = smov 64  }
  0x55   : > { %2662 = dma.hbm_to_vmem [thread:$0]  (!%p3193_p0), %s646_s29, 3072, %s648_s2, %s636_s8, %s3597_s25, %s3597_s25, %s3596_s5  }
  0x56   : > { %s2195_s19 = sshll.u32 %s3188_s6, 6  ;;  %s2547_s26 = sshll.u32 %s2997_s30, 6 }
  0x57   : > { %s701_s22 = scalar_lea.hbm %s3544_s10, %s2547_s26  ;;  %s696_s15 = scalar_lea.vmem [#allocation12], %s2195_s19 }
  0x58   : > { %s702_s17 = sshll.u32 %s701_s22, 4  ;;  %s704_s16 = sshll.u32 %s696_s15, 4  ;;  %s703_s17 = int_to_ptr.hbm [resolvable:$true] %s702_s17  ;;  %s705_s16 = int_to_ptr.vmem [resolvable:$true] %s704_s16 }
  0x59   : > { %s2827_s27 = sshra.s32 %s703_s17, 4  ;;  %s2834_s29 = scalar_lea.hbm %s3544_s10, 192  ;;  %s2828_s27 = int_to_ptr.hbm [resolvable:$true] %s2827_s27 }
  0x5a   : > { %s2829_s23 = scalar_lea.hbm %s2828_s27, 64  ;;  %p2835_p7 = scmp.lt.s32.totalorder %s2828_s27, %s3544_s10 }
  0x5b   : > { %p2830_p12 = scmp.ne.s32.totalorder %s2828_s27, %s2829_s23  ;;  %p2836_p8 = scmp.lt.s32.totalorder %s2834_s29, %s2829_s23 }
  0x5d   : > { %p2832_p13 = pnand %p2830_p12, %p2771_p3  ;;  %p2837_p9 = por %p2836_p8, %p2835_p7 }
  0x5f   : > { %p2833_p2 = pneg %p2832_p13 }
  0x61   : > { %p2838_p10 = pnand %p2837_p9, %p2833_p2 }
  0x63   : > { %2841 = shalt.err (!%p2838_p10)
}
  0x64   : > { %2668 = dma.hbm_to_vmem [thread:$0]  (!%p3193_p0), %s703_s17, 1024, %s705_s16, %s3206_s1, %s3597_s25, %s3597_s25, %s3596_s5  }
  0x65   : > { %s729_s15 = scalar_lea.hbm %s3546_s12, %s2547_s26  ;;  %s724_s6 = scalar_lea.vmem [#allocation13], %s2195_s19 }
  0x66   : > { %s730_s8 = sshll.u32 %s729_s15, 4  ;;  %s732_s27 = sshll.u32 %s724_s6, 4  ;;  %s731_s8 = int_to_ptr.hbm [resolvable:$true] %s730_s8  ;;  %s733_s27 = int_to_ptr.vmem [resolvable:$true] %s732_s27 }
  0x67   : > { %s3598_s23 = sand.u32 1, %s2997_s30   ;;  %s2857_s2 = sshra.s32 %s731_s8, 4  ;;  %s2858_s2 = int_to_ptr.hbm [resolvable:$true] %s2857_s2 }
  0x68   : > { %s721_s29 = scalar_lea.sflag [#allocation14], %s3598_s23  ;;  %s2859_s3 = scalar_lea.hbm %s2858_s2, 64 }
  0x69   : > { %p2860_p11 = scmp.ne.s32.totalorder %s2858_s2, %s2859_s3  ;;  %s2864_s16 = scalar_lea.hbm %s3546_s12, 192 }
  0x6a   : > { %p2865_p2 = scmp.lt.s32.totalorder %s2858_s2, %s3546_s12  ;;  %p2866_p7 = scmp.lt.s32.totalorder %s2864_s16, %s2859_s3 }
  0x6b   : > { %p2862_p12 = pnand %p2860_p11, %p2771_p3 }
  0x6c   : > { %p2867_p8 = por %p2866_p7, %p2865_p2 }
  0x6d   : > { %p2863_p13 = pneg %p2862_p12 }
  0x6f   : > { %p2868_p9 = pnand %p2867_p8, %p2863_p13 }
  0x71   : > { %2871 = shalt.err (!%p2868_p9)
}
  0x72   : > { %2671 = dma.hbm_to_vmem [thread:$0]  (!%p3193_p0), %s731_s8, 1024, %s733_s27, %s721_s29, %s3597_s25, %s3597_s25, %s3596_s5  }
  0x73   : > { %750 = sbr.rel (%p3163_p6) target bundleno = 1398 (0x576), region = 104  ;;  %s752_s30 = sand.u32 (!%p3163_p6), 1, %s2989_s28  }
  0x74   : > { %s2633_s19 = smul.u32 (!%p3163_p6), 192, %s752_s30  ;;  %s753_s22 = scalar_lea.sflag (!%p3163_p6), [#allocation8], %s752_s30 }
  0x76   : > { %s3286_s15 = scalar_lea.vmem (!%p3163_p6), [#allocation7], %s2633_s19 }
  0x78   : > { %2960 = dma.done.wait (%p3156_p5), %s753_s22, 3072  }
  0x79   : > { %2962 = vsyncadd (%p3156_p5), %s753_s22, 4294964224  ;;  %s762_s20 = sand.u32 1, %s3147_s4   ;;  %s3293_s5 = scalar_lea.vmem [#allocation10], %s2633_s19 }
  0x7a   : > { %s763_s6 = scalar_lea.sflag [#allocation11], %s762_s20 }
  0x7b   : > { %2964 = dma.done.wait (%p3156_p5), %s763_s6, 4096  }
  0x7c   : > { %2966 = vsyncadd (%p3156_p5), %s763_s6, 4294963200  ;;  %s2202_s24 = sshll.u32 %s752_s30, 6  ;;  %s783_s8 = scalar_lea.sflag [#allocation14], %s762_s20 }
  0x7d   : > { %s3299_s25 = scalar_lea.vmem [#allocation12], %s2202_s24  ;;  %s3301_s27 = scalar_lea.vmem [#allocation13], %s2202_s24 }
  0x7e   : > { %2968 = dma.done.wait (%p3156_p5), %s783_s8, 1024  }
  0x7f   : > { %2970 = vsyncadd (%p3156_p5), %s783_s8, 4294966272 }
  0x80   : > { %2972 = dma.done.wait (%p191_p1), [#allocation14], 2048  }
  0x81   : > { %2974 = vsyncadd (%p191_p1), [#allocation14], 4294965248  ;;  %p876_p6 = scmp.lt.s32.totalorder %s3147_s4, 2  ;;  %s3599_s8 = sld [smem:[#allocation30_spill]] (!%p2191_p4) }
  0x82   : > { %s3600_s26 = sld [smem:[#allocation31_spill]] (!%p2191_p4) }
  0x83   : > { %s3313_s23 = scalar_select %p876_p6, %s3147_s4, 2 }
  0x84   : > { %892 = sbr.rel (%p2191_p4) target bundleno = 265 (0x109), region = 128  ;;  %s3601_s19 = sld [smem:[#allocation32_spill]] (!%p2191_p4) }
  0x85   : > { %s878_s0 = scalar_lea.vmem %s3541_s7, %s3313_s23  ;;  %s2634_s3 = smul.u32 3, %s3313_s23 }
  0x86   : > { %s885_s16 = scalar_lea.vmem %s3545_s11, %s3313_s23  ;;  %s888_s30 = scalar_lea.vmem %s3547_s13, %s3313_s23 }
  0x87   : > { %s3331_s20 = scalar_lea.vmem %s3543_s9, %s2634_s3  ;;  %s3602_s24 = sld [smem:[#allocation28_spill]] (!%p2191_p4) }
  0x88   : > { %s3603_s1 = sld [smem:[#allocation29_spill]] (!%p2191_p4) }
  0x89   : > { %v899_v0 = vld [vmem:[%s3599_s8] sm:$0xff]  ;;  %v3004_v1 = vmov 0   ;;  %v900_v2 = vld [vmem:[%s3599_s8 + $0x8] sm:$0xff]  ;;  %v897_v5 = vlaneseq  ;;  %vm911_vm2 = vcmask 64512   ;;  %v3005_v7 = vmov 0.0  }
  0x8a   : > { %2725 = vset.pattern.permute.xlu0 %v3004_v1  ;;  %v2726_v3 = vld [vmem:[%s3600_s26] ss:$0 sm:$0xff] }
  0x8b   : > { %902 = vperm.xlu0 %2725, %v899_v0   ;;  %v2727_v4 = vld [vmem:[%s3601_s19] ss:$0 sm:$0xff]  ;;  %v915_v6 = vshrl.u32 %v897_v5, 7  ;;  %v898_v12 = vand.u32 127, %v897_v5 }
  0x8d   : > { %vm918_vm0 = vcmp.eq.s32.totalorder %v915_v6, %v2726_v3  ;;  %vm923_vm1 = vcmp.eq.s32.totalorder %v915_v6, %v2727_v4  ;;  %v893_v10 = vld [vmem:[%s3602_s24] sm:$0xff] }
  0x8e   : > { %v919_v8 = vsel %vm918_vm0, 1.0, %v3005_v7  ;;  %v924_v9 = vsel %vm923_vm1, 1.0, %v3005_v7  ;;  %v895_v11 = vld [vmem:[%s3603_s1] sm:$0xff]  ;;  %894 = vst [vmem:[#allocation2] sm:$0xff] %v893_v10 }
  0x8f   : > { %920 = vst.msk [vmem:[#allocation5] sm:$0xff] %vm911_vm2, %v919_v8 }
  0x90   : > { %925 = vst.msk [vmem:[#allocation6] sm:$0xff] %vm911_vm2, %v924_v9 }
  0x91   : > { %896 = vst [vmem:[#allocation3] sm:$0xff] %v895_v11 }
  0x93   : > { %905 = vperm.xlu0 %2725, %v900_v2  }
  0xfd   : > { %v903_v13 = vpop.permute.xlu0 %902 }
  0xfe   : > { %vm907_vm3 = vcmp.eq.s32.totalorder %v898_v12, %v903_v13 }
  0xff   : > { %v909_v14 = vsel %vm907_vm3, 1.0, %v3005_v7 }
 0x100   : > { %912 = vst.msk [vmem:[#allocation4] sm:$0xff] %vm911_vm2, %v909_v14 }
 0x105   : > { %v906_v15 = vpop.permute.xlu0 %905 }
 0x106   : > { %vm908_vm4 = vcmp.eq.s32.totalorder %v898_v12, %v906_v15 }
 0x107   : > { %v910_v16 = vsel %vm908_vm4, 1.0, %v3005_v7 }
 0x108   : > { %913 = vst.msk [vmem:[#allocation4 + $0x8] sm:$0xff] %vm911_vm2, %v910_v16 }
 0x109 PF: > { %v926_v17 = vld [vmem:[#allocation2] sm:$0xff]  ;;  %v928_v18 = vld [vmem:[#allocation4] sm:$0xff]  ;;  %vm930_vm5 = vcmask 64512   ;;  %v2556_v19 = vld [vmem:[%s3286_s15 + $0x38] sm:$0xff]  ;;  %s3604_s3 = sld [smem:[#allocation33_spill]]  ;;  %p2466_p1 = scmp.ne.s32.totalorder %s3147_s4, 2 }
 0x10a   : > { %952 = vmatpush.msra.mxu0 %v926_v17  ;;  %v2564_v20 = vld [vmem:[%s3286_s15 + $0x78] sm:$0xff]  ;;  %1103 = vmatpush.bf16.msra.mxu2 %v2556_v19  ;;  %v2555_v22 = vld [vmem:[%s3286_s15 + $0x30] sm:$0xff]  ;;  %v2554_v26 = vld [vmem:[%s3286_s15 + $0x28] sm:$0xff]  ;;  %s3605_s23 = sld [smem:[#allocation36_spill]] (!%p2466_p1) }
 0x10b   : > { %2206 = vmatmul.msk.f32.vlgmr.msra.gmra.mxu0 %vm930_vm5, %v928_v18  ;;  %v2572_v21 = vld [vmem:[%s3286_s15 + $0xb8] sm:$0xff]  ;;  %1042 = vmatpush.bf16.msra.mxu1 %v2564_v20  ;;  %v2563_v23 = vld [vmem:[%s3286_s15 + $0x70] sm:$0xff]  ;;  %v2562_v27 = vld [vmem:[%s3286_s15 + $0x68] sm:$0xff]  ;;  %s3606_s24 = sld [smem:[#allocation38_spill]] (!%p2466_p1) }
 0x10c   : > { %1181 = vmatpush.bf16.msra.mxu3 %v2572_v21  ;;  %v2571_v24 = vld [vmem:[%s3286_s15 + $0xb0] sm:$0xff]  ;;  %v2570_v28 = vld [vmem:[%s3286_s15 + $0xa8] sm:$0xff]  ;;  %v2553_v29 = vld [vmem:[%s3286_s15 + $0x20] sm:$0xff]  ;;  %s3607_s1 = sld [smem:[#allocation39_spill]] (!%p2466_p1) }
 0x10d   : > { %v2561_v30 = vld [vmem:[%s3286_s15 + $0x60] sm:$0xff]  ;;  %v2552_v32 = vld [vmem:[%s3286_s15 + $0x18] sm:$0xff]  ;;  %v2551_v35 = vld [vmem:[%s3286_s15 + $0x10] sm:$0xff] }
 0x10e   : > { %1104 = vmatpush.bf16.msra.mxu2 %v2555_v22  ;;  %v2569_v31 = vld [vmem:[%s3286_s15 + $0xa0] sm:$0xff]  ;;  %v2560_v33 = vld [vmem:[%s3286_s15 + $0x58] sm:$0xff]  ;;  %v2559_v36 = vld [vmem:[%s3286_s15 + $0x50] sm:$0xff] }
 0x10f   : > { %v929_v25 = vld [vmem:[#allocation4 + $0x8] sm:$0xff]  ;;  %1043 = vmatpush.bf16.msra.mxu1 %v2563_v23  ;;  %v2568_v34 = vld [vmem:[%s3286_s15 + $0x98] sm:$0xff]  ;;  %v2549_v39 = vld [vmem:[%s3286_s15] sm:$0xff] }
 0x110   : > { %1182 = vmatpush.bf16.msra.mxu3 %v2571_v24  ;;  %v2550_v37 = vld [vmem:[%s3286_s15 + $0x8] sm:$0xff]  ;;  %v2567_v40 = vld [vmem:[%s3286_s15 + $0x90] sm:$0xff]  ;;  %v2557_v41 = vld [vmem:[%s3286_s15 + $0x40] sm:$0xff] }
 0x111   : > { %v2558_v38 = vld [vmem:[%s3286_s15 + $0x48] sm:$0xff]  ;;  %v927_v43 = vld [vmem:[#allocation3] sm:$0xff]  ;;  %v2565_v45 = vld [vmem:[%s3286_s15 + $0x80] sm:$0xff] }
 0x112   : > { %1105 = vmatpush.bf16.msra.mxu2 %v2554_v26  ;;  %v2566_v42 = vld [vmem:[%s3286_s15 + $0x88] sm:$0xff]  ;;  %v977_v44 = vpack.c.bf16 %v927_v43, %v927_v43  ;;  %v2595_v47 = vld [vmem:[%s3293_s5 + $0xb0] sm:$0xf0]  ;;  %v2392_v50 = vld [vmem:[%s3293_s5 + $0xb4] sm:$0xf0] }
 0x113   : > { %2207 = vmatmul.msk.f32.gmra.mxu0 %vm930_vm5, %v929_v25  ;;  %1044 = vmatpush.bf16.msra.mxu1 %v2562_v27  ;;  %v2390_v46 = vld [vmem:[%s3293_s5 + $0xa8] sm:$0xf]  ;;  %v2594_v48 = vld [vmem:[%s3293_s5 + $0xac] sm:$0xf]  ;;  %v2398_v51 = vld [vmem:[%s3293_s5 + $0xb0] sm:$0xf] }
 0x114   : > { %1183 = vmatpush.bf16.msra.mxu3 %v2570_v28  ;;  %v2391_v49 = vor.u32 %v2595_v47, %v2390_v46  ;;  %v2596_v52 = vld [vmem:[%s3293_s5 + $0xb8] sm:$0xf0]  ;;  %v2395_v53 = vor.u32 %v2594_v48, %v2392_v50  ;;  %v2378_v55 = vld [vmem:[%s3293_s5 + $0x90] sm:$0xf]  ;;  %v2591_v57 = vld [vmem:[%s3293_s5 + $0x94] sm:$0xf] }
 0x115   : > { %v2399_v54 = vor.u32 %v2596_v52, %v2398_v51  ;;  %v2592_v56 = vld [vmem:[%s3293_s5 + $0x98] sm:$0xf0]  ;;  %v2380_v59 = vld [vmem:[%s3293_s5 + $0x9c] sm:$0xf0]  ;;  %v2386_v60 = vld [vmem:[%s3293_s5 + $0x98] sm:$0xf] }
 0x116   : > { %1106 = vmatpush.bf16.msra.mxu2 %v2553_v29  ;;  %1370 = vmatpush.bf16.msrb.mxu0 %v2391_v49  ;;  %v2379_v58 = vor.u32 %v2592_v56, %v2378_v55  ;;  %v2593_v61 = vld [vmem:[%s3293_s5 + $0xa0] sm:$0xf0]  ;;  %v2383_v62 = vor.u32 %v2591_v57, %v2380_v59  ;;  %v2366_v0 = vld [vmem:[%s3293_s5 + $0x78] sm:$0xf]  ;;  %v2588_v2 = vld [vmem:[%s3293_s5 + $0x7c] sm:$0xf] }
 0x117   : > { %1045 = vmatpush.bf16.msra.mxu1 %v2561_v30  ;;  %v2387_v63 = vor.u32 %v2593_v61, %v2386_v60  ;;  %v2589_v1 = vld [vmem:[%s3293_s5 + $0x80] sm:$0xf0]  ;;  %v2368_v3 = vld [vmem:[%s3293_s5 + $0x84] sm:$0xf0]  ;;  %v2374_v4 = vld [vmem:[%s3293_s5 + $0x80] sm:$0xf] }
 0x118   : > { %1184 = vmatpush.bf16.msra.mxu3 %v2569_v31  ;;  %v2590_v5 = vld [vmem:[%s3293_s5 + $0x88] sm:$0xf0]  ;;  %v2367_v6 = vor.u32 %v2589_v1, %v2366_v0  ;;  %v2371_v7 = vor.u32 %v2588_v2, %v2368_v3  ;;  %v2354_v13 = vld [vmem:[%s3293_s5 + $0x60] sm:$0xf]  ;;  %v2585_v15 = vld [vmem:[%s3293_s5 + $0x64] sm:$0xf] }
 0x119   : > { %v2375_v8 = vor.u32 %v2590_v5, %v2374_v4  ;;  %v2586_v14 = vld [vmem:[%s3293_s5 + $0x68] sm:$0xf0]  ;;  %v2356_v17 = vld [vmem:[%s3293_s5 + $0x6c] sm:$0xf0]  ;;  %v2362_v18 = vld [vmem:[%s3293_s5 + $0x68] sm:$0xf] }
 0x11a   : > { %1107 = vmatpush.bf16.msra.mxu2 %v2552_v32  ;;  %1371 = vmatpush.bf16.msrb.mxu0 %v2379_v58  ;;  %v2355_v16 = vor.u32 %v2586_v14, %v2354_v13  ;;  %v2587_v19 = vld [vmem:[%s3293_s5 + $0x70] sm:$0xf0]  ;;  %v2359_v20 = vor.u32 %v2585_v15, %v2356_v17  ;;  %v2342_v23 = vld [vmem:[%s3293_s5 + $0x48] sm:$0xf]  ;;  %v2582_v25 = vld [vmem:[%s3293_s5 + $0x4c] sm:$0xf] }
 0x11b   : > { %1046 = vmatpush.bf16.msra.mxu1 %v2560_v33  ;;  %v2363_v21 = vor.u32 %v2587_v19, %v2362_v18  ;;  %v2583_v24 = vld [vmem:[%s3293_s5 + $0x50] sm:$0xf0]  ;;  %v2344_v27 = vld [vmem:[%s3293_s5 + $0x54] sm:$0xf0]  ;;  %v2350_v28 = vld [vmem:[%s3293_s5 + $0x50] sm:$0xf] }
 0x11c   : > { %1185 = vmatpush.bf16.msra.mxu3 %v2568_v34  ;;  %v2343_v26 = vor.u32 %v2583_v24, %v2342_v23  ;;  %v2584_v29 = vld [vmem:[%s3293_s5 + $0x58] sm:$0xf0]  ;;  %v2347_v30 = vor.u32 %v2582_v25, %v2344_v27  ;;  %v2330_v32 = vld [vmem:[%s3293_s5 + $0x30] sm:$0xf]  ;;  %v2579_v34 = vld [vmem:[%s3293_s5 + $0x34] sm:$0xf] }
 0x11d   : > { %v2351_v31 = vor.u32 %v2584_v29, %v2350_v28  ;;  %v2580_v33 = vld [vmem:[%s3293_s5 + $0x38] sm:$0xf0]  ;;  %v2577_v43 = vld [vmem:[%s3293_s5 + $0x20] sm:$0xf0]  ;;  %v2320_v46 = vld [vmem:[%s3293_s5 + $0x24] sm:$0xf0] }
 0x11e   : > { %1108 = vmatpush.bf16.msra.mxu2 %v2551_v35  ;;  %1372 = vmatpush.bf16.msrb.mxu0 %v2367_v6  ;;  %v2331_v35 = vor.u32 %v2580_v33, %v2330_v32  ;;  %v2326_v47 = vld [vmem:[%s3293_s5 + $0x20] sm:$0xf]  ;;  %v2578_v48 = vld [vmem:[%s3293_s5 + $0x28] sm:$0xf0]  ;;  %v2308_v55 = vld [vmem:[%s3293_s5 + $0xc] sm:$0xf0] }
 0x11f   : > { %1047 = vmatpush.bf16.msra.mxu1 %v2559_v36  ;;  %v2332_v36 = vld [vmem:[%s3293_s5 + $0x3c] sm:$0xf0]  ;;  %v2327_v50 = vor.u32 %v2578_v48, %v2326_v47  ;;  %v2574_v52 = vld [vmem:[%s3293_s5 + $0x8] sm:$0xf0]  ;;  %v2314_v56 = vld [vmem:[%s3293_s5 + $0x8] sm:$0xf] }
 0x120   : > { %1186 = vmatpush.bf16.msra.mxu3 %v2567_v40  ;;  %v2306_v51 = vld [vmem:[%s3293_s5] sm:$0xf]  ;;  %v2575_v57 = vld [vmem:[%s3293_s5 + $0x10] sm:$0xf0]  ;;  %v2600_v15 = vld [vmem:[%s3299_s25 + $0x18] sm:$0xff] }
 0x121   : > { %v2315_v59 = vor.u32 %v2575_v57, %v2314_v56  ;;  %v1460_v6 = vld [vmem:[%s3604_s3] sm:$0xff]  ;;  %v2598_v32 = vld [vmem:[%s3299_s25 + $0x8] sm:$0xff]  ;;  %v2597_v33 = vld [vmem:[%s3299_s25] sm:$0xff] }
 0x122   : > { %1109 = vmatpush.bf16.msra.mxu2 %v2550_v37  ;;  %1373 = vmatpush.bf16.msrb.mxu0 %v2355_v16  ;;  %v2338_v37 = vld [vmem:[%s3293_s5 + $0x38] sm:$0xf]  ;;  %v1412_v23 = vld [vmem:[#allocation5] sm:$0xff]  ;;  %v2605_v47 = vld [vmem:[%s3301_s27] sm:$0xff] }
 0x123   : > { %1048 = vmatpush.bf16.msra.mxu1 %v2558_v38  ;;  %v2581_v38 = vld [vmem:[%s3293_s5 + $0x40] sm:$0xf0]  ;;  %v2730_v48 = vld [vmem:[%s885_s16] ss:$0 sm:$0xff] }
 0x124   : > { %1187 = vmatpush.bf16.msra.mxu3 %v2566_v42  ;;  %v2339_v40 = vor.u32 %v2581_v38, %v2338_v37  ;;  %v2318_v42 = vld [vmem:[%s3293_s5 + $0x18] sm:$0xf]  ;;  %v2609_v37 = vld [vmem:[%s3301_s27 + $0x20] sm:$0xff] }
 0x125   : > { %v2608_v38 = vld [vmem:[%s3301_s27 + $0x18] sm:$0xff] }
 0x126   : > { %1110 = vmatpush.bf16.msra.mxu2 %v2549_v39  ;;  %1374 = vmatpush.bf16.msrb.mxu0 %v2343_v26  ;;  %v2335_v39 = vor.u32 %v2579_v34, %v2332_v36  ;;  %v2612_v34 = vld [vmem:[%s3301_s27 + $0x38] sm:$0xff]  ;;  %v2610_v36 = vld [vmem:[%s3301_s27 + $0x28] sm:$0xff] }
 0x127   : > { %1049 = vmatpush.bf16.msra.mxu1 %v2557_v41 }
 0x128   : > { %1188 = vmatpush.bf16.msra.mxu3 %v2565_v45  ;;  %v2319_v45 = vor.u32 %v2577_v43, %v2318_v42 }
 0x12a   : > { %1050 = vmatmul.bf16.vlgmr.msra.gmra.mxu1 %v977_v44  ;;  %1396 = vmatpush.bf16.msrb.mxu2 %v2399_v54  ;;  %v2576_v44 = vld [vmem:[%s3293_s5 + $0x1c] sm:$0xf]  ;;  %v2307_v54 = vor.u32 %v2574_v52, %v2306_v51 }
 0x12b   : > { %1383 = vmatpush.bf16.msrb.mxu1 %v2395_v53  ;;  %1375 = vmatpush.bf16.msrb.mxu0 %v2331_v35  ;;  %v2323_v49 = vor.u32 %v2576_v44, %v2320_v46  ;;  %v2573_v53 = vld [vmem:[%s3293_s5 + $0x4] sm:$0xf]  ;;  %v2611_v35 = vld [vmem:[%s3301_s27 + $0x30] sm:$0xff]  ;;  %v2606_v46 = vld [vmem:[%s3301_s27 + $0x8] sm:$0xff]  ;;  %s3608_s5 = sld [smem:[#allocation37_spill]] (!%p2466_p1) }
 0x12c   : > { %v2311_v58 = vor.u32 %v2573_v53, %v2308_v55 }
 0x12e   : > { %1397 = vmatpush.bf16.msrb.mxu2 %v2387_v63 }
 0x12f   : > { %1384 = vmatpush.bf16.msrb.mxu1 %v2383_v62  ;;  %1376 = vmatpush.bf16.msrb.mxu0 %v2319_v45  ;;  %v2729_v62 = vld [vmem:[%s878_s0] ss:$0 sm:$0xff] }
 0x132   : > { %1398 = vmatpush.bf16.msrb.mxu2 %v2375_v8  ;;  %v3006_v8 = vmov 0  }
 0x133   : > { %1385 = vmatpush.bf16.msrb.mxu1 %v2371_v7  ;;  %1377 = vmatpush.bf16.msrb.mxu0 %v2307_v54  ;;  %v2604_v7 = vld [vmem:[%s3299_s25 + $0x38] sm:$0xff]  ;;  %v2731_v54 = vld [vmem:[%s888_s30] ss:$0 sm:$0xff] }
 0x134   : > { %2728 = vset.pattern.permute.xlu0 %v3006_v8  ;;  %1536 = vmatpush.bf16.msrb.mxu3 %v2604_v7 }
 0x135   : > { %1463 = vperm.xlu0 %2728, %v1460_v6  }
 0x136   : > { %1399 = vmatpush.bf16.msrb.mxu2 %v2363_v21 }
 0x137   : > { %1386 = vmatpush.bf16.msrb.mxu1 %v2359_v20  ;;  %v2599_v20 = vld [vmem:[%s3299_s25 + $0x10] sm:$0xff]  ;;  %1619 = vmatpush.bf16.msra.mxu0 %v2612_v34 }
 0x13a   : > { %1400 = vmatpush.bf16.msrb.mxu2 %v2351_v31 }
 0x13b   : > { %1387 = vmatpush.bf16.msrb.mxu1 %v2347_v30  ;;  %v1413_v30 = vld [vmem:[#allocation6] sm:$0xff]  ;;  %1620 = vmatpush.bf16.msra.mxu0 %v2611_v35 }
 0x13e   : > { %1401 = vmatpush.bf16.msrb.mxu2 %v2339_v40 }
 0x13f   : > { %1388 = vmatpush.bf16.msrb.mxu1 %v2335_v39  ;;  %1621 = vmatpush.bf16.msra.mxu0 %v2610_v36  ;;  %v2607_v39 = vld [vmem:[%s3301_s27 + $0x10] sm:$0xff] }
 0x142   : > { %1402 = vmatpush.bf16.msrb.mxu2 %v2327_v50 }
 0x143   : > { %1389 = vmatpush.bf16.msrb.mxu1 %v2323_v49  ;;  %1622 = vmatpush.bf16.msra.mxu0 %v2609_v37 }
 0x146   : > { %1403 = vmatpush.bf16.msrb.mxu2 %v2315_v59 }
 0x147   : > { %1390 = vmatpush.bf16.msrb.mxu1 %v2311_v58  ;;  %1623 = vmatpush.bf16.msra.mxu0 %v2608_v38 }
 0x14b   : > { %1624 = vmatpush.bf16.msra.mxu0 %v2607_v39 }
 0x14f   : > { %1625 = vmatpush.bf16.msra.mxu0 %v2606_v46 }
 0x153   : > { %1626 = vmatpush.bf16.msra.mxu0 %v2605_v47 }
 0x188   : > { %v954_v9 = vpop.f32.mrf.mxu0 }
 0x189   : > { %v960_v10 = vpack.c.bf16 %v954_v9, %v954_v9  ;;  %v2603_v9 = vld [vmem:[%s3299_s25 + $0x30] sm:$0xff] }
 0x18a   : > { %1537 = vmatpush.bf16.msrb.mxu3 %v2603_v9 }
 0x18b   : > { %1111 = vmatmul.bf16.vlgmr.msra.gmra.mxu2 %v960_v10  ;;  %v2602_v10 = vld [vmem:[%s3299_s25 + $0x28] sm:$0xff] }
 0x18e   : > { %1538 = vmatpush.bf16.msrb.mxu3 %v2602_v10 }
 0x190   : > { %v957_v11 = vpop.f32.mrf.mxu0 }
 0x191   : > { %v1116_v12 = vpack.c.bf16 %v957_v11, %v957_v11  ;;  %v2601_v11 = vld [vmem:[%s3299_s25 + $0x20] sm:$0xff]  ;;  %s3609_s25 = sld [smem:[#allocation41_spill]] (!%p2466_p1) }
 0x192   : > { %1539 = vmatpush.bf16.msrb.mxu3 %v2601_v11 }
 0x193   : > { %1189 = vmatmul.bf16.vlgmr.msra.gmra.mxu3 %v1116_v12  ;;  %v1234_v12 = vld [vmem:[%s3331_s20] sm:$0x7] }
 0x194   : > { %v1236_v13 = vperm.slane %v1234_v12, 0  ;;  %v1237_v14 = vperm.slane %v1234_v12, 1  ;;  %v1238_v24 = vperm.slane %v1234_v12, 2 }
 0x196   : > { %1540 = vmatpush.bf16.msrb.mxu3 %v2600_v15 }
 0x19a   : > { %1541 = vmatpush.bf16.msrb.mxu3 %v2599_v20 }
 0x19e   : > { %1542 = vmatpush.bf16.msrb.mxu3 %v2598_v32 }
 0x1a2   : > { %1543 = vmatpush.bf16.msrb.mxu3 %v2597_v33 }
 0x1a7   : > { %v1051_v22 = vpop.f32.mrf.mxu1  ;;  %v1464_v42 = vpop.permute.xlu0 %1463 }
 0x1af   : > { %v1053_v41 = vpop.f32.mrf.mxu1 }
 0x20e   : > { %v1112_v60 = vpop.f32.mrf.mxu2 }
 0x20f   : > { %v1113_v61 = vadd.f32 %v1112_v60, %v1051_v22 }
 0x216   : > { %v1114_v63 = vpop.f32.mrf.mxu2  ;;  %v1190_v0 = vpop.f32.mrf.mxu3 }
 0x217   : > { %v1194_v1 = vadd.f32 %v1190_v0, %v1113_v61 }
 0x219   : > { %v1199_v2 = vadd.f32 %v2729_v62, %v1194_v1 }
 0x21b   : > { %v1200_v3 = vmax.f32 %v1199_v2, 0.0 }
 0x21d   : > { %v1201_v4 = vpack.c.bf16 %v1200_v3, %v1200_v3 }
 0x21e   : > { %v1192_v5 = vpop.f32.mrf.mxu3 }
 0x21f   : > { %1378 = vmatmul.bf16.vlgmr.msrb.gmra.mxu0 %v1201_v4  ;;  %1391 = vmatmul.bf16.vlgmr.msrb.gmra.mxu1 %v1201_v4 }
 0x220   : > { %1404 = vmatmul.bf16.vlgmr.msrb.gmra.mxu2 %v1201_v4 }
 0x29c   : > { %v1379_v16 = vpop.f32.mrf.mxu0  ;;  %v1392_v17 = vpop.f32.mrf.mxu1 }
 0x29d   : > { %v1380_v18 = vadd.f32 %v1379_v16, %v1236_v13  ;;  %v1393_v19 = vadd.f32 %v1392_v17, %v1237_v14 }
 0x29f   : > { %v1409_v21 = vmax.f32 %v1380_v18, 0.0  ;;  %v3446_v22 = vmax.f32 %v1393_v19, 0.0 }
 0x2a1   : > { %1634 = vst [vmem:[#allocation3] sm:$0xff] %v3446_v22  ;;  %1455 = vmatpush.msra.mxu1 %v1409_v21 }
 0x2a2   : > { %2401 = vmatmul.msk.f32.vlgmr.msra.gmra.mxu1 %vm930_vm5, %v1412_v23 }
 0x2a3   : > { %v1405_v25 = vpop.f32.mrf.mxu2 }
 0x2a4   : > { %v1406_v26 = vadd.f32 %v1405_v25, %v1238_v24  ;;  %v1381_v27 = vpop.f32.mrf.mxu0  ;;  %v1394_v28 = vpop.f32.mrf.mxu1 }
 0x2a6   : > { %v1411_v29 = vmax.f32 %v1406_v26, 0.0 }
 0x2a8   : > { %1432 = vmatpush.msra.mxu2 %v1411_v29 }
 0x2a9   : > { %2400 = vmatmul.msk.f32.vlgmr.msra.gmra.mxu2 %vm930_vm5, %v1413_v30 }
 0x2ab   : > { %v1407_v31 = vpop.f32.mrf.mxu2 }
 0x31f   : > { %v1457_v40 = vpop.f32.mrf.mxu1 }
 0x32c   : > { %v1434_v41 = vpop.f32.mrf.mxu2 }
 0x32d   : > { %v1458_v43 = vadd.f32 %v1457_v40, %v1434_v41 }
 0x32f   : > { %v1466_v44 = vmul.f32 %v1464_v42, %v1458_v43 }
 0x331   : > { %v1467_v45 = vpack.c.bf16 %v1466_v44, %v1466_v44 }
 0x333   : > { %1544 = vmatmul.bf16.vlgmr.msrb.gmra.mxu3 %v1467_v45 }
 0x3b6   : > { %v1545_v49 = vpop.f32.mrf.mxu3 }
 0x3b7   : > { %v1546_v50 = vadd.f32 %v2730_v48, %v1545_v49 }
 0x3b9   : > { %v1549_v51 = vmax.f32 %v1546_v50, 0.0 }
 0x3bb   : > { %v1550_v52 = vpack.c.bf16 %v1549_v51, %v1549_v51 }
 0x3bd   : > { %1627 = vmatmul.bf16.vlgmr.msra.gmra.mxu0 %v1550_v52 }
 0x3be   : > { %v1547_v53 = vpop.f32.mrf.mxu3 }
 0x43a   : > { %v1628_v55 = vpop.f32.mrf.mxu0 }
 0x43b   : > { %v1629_v56 = vadd.f32 %v2731_v54, %v1628_v55 }
 0x43d   : > { %v1632_v57 = vmax.f32 %v1629_v56, 0.0 }
 0x43e   : > { %1638 = sbr.rel (%p2466_p1) target bundleno = 1383 (0x567), region = 132 }
 0x43f   : > { %1633 = vst [vmem:[#allocation2] sm:$0xff] %v1632_v57 }
 0x442   : > { %v1630_v58 = vpop.f32.mrf.mxu0 }
 0x443   : > { %1667 = vmatpush.msra.mxu0 %v1632_v57  ;;  %1697 = vmatpush.msra.mxu1 %v3446_v22  ;;  %v1639_v59 = vlaneseq  ;;  %v2733_v60 = vld [vmem:[%s3548_s14] ss:$0 sm:$0xff]  ;;  %v3007_v62 = vmov 0   ;;  %v2628_v1 = vld [vmem:[#allocation15 + $0x78] sm:$0xff]  ;;  %v3008_v3 = vmov 0.0   ;;  %v2626_v9 = vld [vmem:[#allocation15 + $0x68] sm:$0xff] }
 0x444   : > { %v2734_v61 = vld [vmem:[%s3605_s23] ss:$0 sm:$0xff]  ;;  %2732 = vset.pattern.permute.xlu0 %v3007_v62  ;;  %v2620_v2 = vld [vmem:[#allocation15 + $0x38] sm:$0xff]  ;;  %1791 = vmatpush.bf16.msra.mxu2 %v2628_v1  ;;  %v2618_v10 = vld [vmem:[#allocation15 + $0x28] sm:$0xff] }
 0x445   : > { %v1672_v63 = vld [vmem:[%s3606_s24] sm:$0xff]  ;;  %1894 = vmatpush.msrb.mxu0 %v1632_v57  ;;  %v1640_v0 = vshrl.u32 %v1639_v59, 7  ;;  %1852 = vmatpush.bf16.msra.mxu3 %v2620_v2  ;;  %v1871_v11 = vld [vmem:[#allocation4] sm:$0xff]  ;;  %v2624_v14 = vld [vmem:[#allocation15 + $0x58] sm:$0xff] }
 0x446   : > { %1675 = vperm.xlu0 %2732, %v1672_v63   ;;  %v2627_v6 = vld [vmem:[#allocation15 + $0x70] sm:$0xff]  ;;  %v2625_v12 = vld [vmem:[#allocation15 + $0x60] sm:$0xff]  ;;  %v2616_v15 = vld [vmem:[#allocation15 + $0x18] sm:$0xff] }
 0x447   : > { %vm1643_vm6 = vcmp.eq.s32.totalorder %v1640_v0, %v2733_v60  ;;  %vm1647_vm7 = vcmp.eq.s32.totalorder %v1640_v0, %v2734_v61  ;;  %v2619_v7 = vld [vmem:[#allocation15 + $0x30] sm:$0xff]  ;;  %v2617_v13 = vld [vmem:[#allocation15 + $0x20] sm:$0xff]  ;;  %v1872_v16 = vld [vmem:[#allocation4 + $0x8] sm:$0xff]  ;;  %v1902_v25 = vadd.s32 8, %v1640_v0 }
 0x448   : > { %v1644_v4 = vsel %vm1643_vm6, 1.0, %v3008_v3  ;;  %v1648_v5 = vsel %vm1647_vm7, 1.0, %v3008_v3  ;;  %v1702_v8 = vld [vmem:[%s3607_s1] sm:$0xff]  ;;  %1792 = vmatpush.bf16.msra.mxu2 %v2627_v6  ;;  %v2622_v19 = vld [vmem:[#allocation15 + $0x48] sm:$0xff]  ;;  %v2621_v21 = vld [vmem:[#allocation15 + $0x40] sm:$0xff] }
 0x449   : > { %2467 = vmatmul.msk.f32.vlgmr.msra.gmra.mxu0 %vm930_vm5, %v1644_v4  ;;  %2468 = vmatmul.msk.f32.vlgmr.msra.gmra.mxu1 %vm930_vm5, %v1648_v5  ;;  %v2623_v17 = vld [vmem:[#allocation15 + $0x50] sm:$0xff]  ;;  %v2614_v20 = vld [vmem:[#allocation15 + $0x8] sm:$0xff] }
 0x44a   : > { %1955 = vmatpush.msra.mxu0 %v3446_v22  ;;  %1853 = vmatpush.bf16.msra.mxu3 %v2619_v7  ;;  %v2615_v18 = vld [vmem:[#allocation15 + $0x10] sm:$0xff]  ;;  %v2613_v22 = vld [vmem:[#allocation15] sm:$0xff] }
 0x44b   : > { %v2735_v23 = vld [vmem:[%s3608_s5] ss:$0 sm:$0xff] }
 0x44c   : > { %1793 = vmatpush.bf16.msra.mxu2 %v2626_v9  ;;  %vm1905_vm8 = vcmp.eq.s32.totalorder %v1640_v0, %v2735_v23  ;;  %vm1906_vm9 = vcmp.eq.s32.totalorder %v1902_v25, %v2735_v23  ;;  %v2736_v39 = vld [vmem:[%s3609_s25] ss:$0 sm:$0xff] }
 0x44d   : > { %v1907_v24 = vsel %vm1905_vm8, 1.0, %v3008_v3  ;;  %v1908_v26 = vsel %vm1906_vm9, 1.0, %v3008_v3 }
 0x44e   : > { %1705 = vperm.xlu0 %2732, %v1702_v8   ;;  %1854 = vmatpush.bf16.msra.mxu3 %v2618_v10 }
 0x450   : > { %1794 = vmatpush.bf16.msra.mxu2 %v2625_v12 }
 0x451   : > { %2533 = vmatmul.msk.f32.vlgmr.msrb.gmra.mxu0 %vm930_vm5, %v1871_v11 }
 0x452   : > { %1855 = vmatpush.bf16.msra.mxu3 %v2617_v13 }
 0x454   : > { %1795 = vmatpush.bf16.msra.mxu2 %v2624_v14 }
 0x456   : > { %1856 = vmatpush.bf16.msra.mxu3 %v2616_v15 }
 0x458   : > { %1796 = vmatpush.bf16.msra.mxu2 %v2623_v17 }
 0x459   : > { %2534 = vmatmul.msk.f32.gmra.mxu0 %vm930_vm5, %v1872_v16 }
 0x45a   : > { %1857 = vmatpush.bf16.msra.mxu3 %v2615_v18 }
 0x45c   : > { %1797 = vmatpush.bf16.msra.mxu2 %v2622_v19 }
 0x45e   : > { %1858 = vmatpush.bf16.msra.mxu3 %v2614_v20 }
 0x460   : > { %1798 = vmatpush.bf16.msra.mxu2 %v2621_v21 }
 0x461   : > { %2537 = vmatmul.msk.f32.vlgmr.msra.gmra.mxu0 %vm930_vm5, %v1907_v24 }
 0x462   : > { %1859 = vmatpush.bf16.msra.mxu3 %v2613_v22 }
 0x469   : > { %2538 = vmatmul.msk.f32.gmra.mxu0 %vm930_vm5, %v1908_v26 }
 0x4b8   : > { %v1676_v27 = vpop.permute.xlu0 %1675 }
 0x4c0   : > { %v1706_v28 = vpop.permute.xlu0 %1705 }
 0x4c6   : > { %v1669_v29 = vpop.f32.mrf.mxu0  ;;  %v1699_v30 = vpop.f32.mrf.mxu1 }
 0x4c7   : > { %v1678_v31 = vmul.f32 %v1676_v27, %v1669_v29  ;;  %v1708_v32 = vmul.f32 %v1706_v28, %v1699_v30 }
 0x4c9   : > { %v1709_v33 = vpack.c.bf16 %v1678_v31, %v1678_v31  ;;  %v1726_v34 = vpack.c.bf16 %v1708_v32, %v1708_v32 }
 0x4cb   : > { %1799 = vmatmul.bf16.vlgmr.msra.gmra.mxu2 %v1726_v34  ;;  %1860 = vmatmul.bf16.vlgmr.msra.gmra.mxu3 %v1709_v33 }
 0x4ce   : > { %v1896_v35 = vpop.f32.mrf.mxu0 }
 0x4cf   : > { %1930 = vmatpush.msrb.mxu1 %v1896_v35 }
 0x4d0   : > { %2535 = vmatmul.msk.f32.vlgmr.msrb.gmra.mxu1 %vm930_vm5, %v1907_v24 }
 0x4d6   : > { %v1899_v36 = vpop.f32.mrf.mxu0 }
 0x4d7   : > { %1980 = vmatpush.msra.mxu1 %v1899_v36 }
 0x4d8   : > { %2536 = vmatmul.msk.f32.gmra.mxu1 %vm930_vm5, %v1908_v26 }
 0x4de   : > { %v1957_v37 = vpop.f32.mrf.mxu0 }
 0x4df   : > { %1963 = vst [vmem:[#allocation16 + $0x8] sm:$0xff] %v1957_v37 }
 0x4e0   : > { %2539 = vmatmul.msk.f32.vlgmr.msra.gmra.mxu1 %vm930_vm5, %v1907_v24 }
 0x4e6   : > { %v1960_v38 = vpop.f32.mrf.mxu0 }
 0x4e7   : > { %1964 = vst [vmem:[#allocation16 + $0x20] sm:$0xff] %v1960_v38 }
 0x4e8   : > { %2540 = vmatmul.msk.f32.gmra.mxu1 %vm930_vm5, %v1908_v26 }
 0x54d   : > { %v1932_v40 = vpop.f32.mrf.mxu1 }
 0x54e   : > { %v1800_v41 = vpop.f32.mrf.mxu2  ;;  %v1861_v42 = vpop.f32.mrf.mxu3  ;;  %1938 = vst [vmem:[#allocation16] sm:$0xff] %v1932_v40 }
 0x54f   : > { %v1862_v43 = vadd.f32 %v1861_v42, %v1800_v41 }
 0x551   : > { %v1869_v44 = vadd.f32 %v2736_v39, %v1862_v43 }
 0x553   : > { %1870 = vst [vmem:[#allocation17] sm:$0xff] %v1869_v44 }
 0x555   : > { %v1935_v45 = vpop.f32.mrf.mxu1 }
 0x556   : > { %v1863_v46 = vpop.f32.mrf.mxu3  ;;  %1939 = vst [vmem:[#allocation16 + $0x18] sm:$0xff] %v1935_v45  ;;  %v1802_v47 = vpop.f32.mrf.mxu2 }
 0x55d   : > { %v1982_v48 = vpop.f32.mrf.mxu1 }
 0x55e   : > { %1988 = vst [vmem:[#allocation16 + $0x10] sm:$0xff] %v1982_v48 }
 0x565   : > { %v1985_v49 = vpop.f32.mrf.mxu1 }
 0x566   : > { %1989 = vst [vmem:[#allocation16 + $0x28] sm:$0xff] %v1985_v49 }
 0x567 PF: > { %p2675_p4 = scmp.eq.s32.totalorder %s3147_s4, 2  ;;  %s3009_s0 = smov [#allocation16]  }
 0x568   : > { %s1995_s20 = sshll.u32 %s3009_s0, 4  ;;  %s3610_s16 = sld [smem:[#allocation42_spill]]  ;;  %s1996_s20 = int_to_ptr.vmem [resolvable:$true] %s1995_s20 }
 0x569   : > { %s3010_s22 = smov 384   ;;  %s3011_s23 = smov 24  }
 0x56a   : > { %s3611_s24 = sld [smem:[#allocation43_spill]]  ;;  %s3012_s2 = smov [#allocation17]  }
 0x56b   : > { %s2010_s1 = sshll.u32 %s3012_s2, 4  ;;  %s2011_s1 = int_to_ptr.vmem [resolvable:$true] %s2010_s1 }
 0x56e   : > { %s1997_s19 = sshll.u32 %s3610_s16, 4  ;;  %s1998_s19 = int_to_ptr.hbm [resolvable:$true] %s1997_s19 }
 0x56f   : > { %2648 = dma.vmem_to_hbm [thread:$0]  (%p2675_p4), %s1996_s20, 768, %s1998_s19, [#allocation9], %s3010_s22, %s3010_s22, %s3011_s23  }
 0x570   : > { %s2012_s29 = sshll.u32 %s3611_s24, 4  ;;  %s2013_s29 = int_to_ptr.hbm [resolvable:$true] %s2012_s29 }
 0x571   : > { %2650 = dma.vmem_to_hbm [thread:$0]  (%p2675_p4), %s2011_s1, 128, %s2013_s29, [#allocation18]  }
 0x572   : > { %2976 = dma.done.wait (%p2675_p4), [#allocation9], 768  }
 0x573   : > { %2978 = vsyncadd (%p2675_p4), [#allocation9], 4294966528 }
 0x574   : > { %2980 = dma.done.wait (%p2675_p4), [#allocation18], 128  }
 0x575   : > { %2982 = vsyncadd (%p2675_p4), [#allocation18], 4294967168 }
 0x576 PF: > { %s3612_s30 = sld [smem:[#allocation26_spill]]  ;;  %s3615_s3 = smov %s2989_s28 }
 0x577   : > { %s3613_s15 = sld [smem:[#allocation25_spill]] }
 0x578   : > { %s3614_s29 = sld [smem:[#allocation27_spill]] }
 0x57c   : > { %p41_p5 = scmp.ge.s32.totalorder %s3612_s30, 5  }
 0x57d   : > { %s3616_s28 = smov %s3613_s15 }
 0x57e   :  { %43 = sbr.rel (!%p41_p5) target bundleno = 26 (0x1a), region = 210 }
 0x583   :  { %2031 = vsyncpa [#allocation8], 1 }
 0x584   :  { %2033 = vsyncpa [#allocation8 + $0x1], 1 }
 0x585   :  { %2034 = vsyncpa [#allocation11], 1 }
 0x586   :  { %2036 = vsyncpa [#allocation11 + $0x1], 1 }
 0x587   :  { %2037 = vsyncpa [#allocation14], 1 }
 0x588   :  { %2039 = vsyncpa [#allocation14 + $0x1], 1 }
 0x589   :  { %2040 = vsyncpa [#allocation9], 1 }
 0x58a   :  { %2042 = vsyncpa [#allocation9 + $0x1], 1 }
 0x58b   :  { %2043 = vsyncpa [#allocation18], 1 }

</bundles_post_ra>
